<compile_context>
chip_gen: v5e
topology: v5e:2x2
jax: 0.10.0
libtpu: 0.0.40
codegen_flags: <defaults>
</compile_context>

<pallas_src>
import jax
import jax.numpy as jnp
from jax.experimental import pallas as pl
from jax.experimental.pallas import tpu as pltpu

EPS = 1e-5


# ----------------------------------------------------------------------------
# VMEM policy (generation-aware) and tile sizing.
# ----------------------------------------------------------------------------
def _vmem_limit_bytes():
    try:
        cap = int(pltpu.get_tpu_info().vmem_capacity_bytes)
    except Exception:
        cap = 64 * 1024 * 1024                      # conservative (v7x-sized) fallback
    return min(cap * 3 // 4, 100 * 1024 * 1024)     # ~96 MiB v5e/v6e, ~48 MiB v7x


_VMEM_LIMIT = _vmem_limit_bytes()
_VMEM_BUDGET = int(_VMEM_LIMIT * 0.55)              # tile-sizing budget (pipeline headroom)


def _compiler_params(grid_rank):
    return pltpu.CompilerParams(
        dimension_semantics=("parallel",) * grid_rank,
        vmem_limit_bytes=_VMEM_LIMIT,
    )


def _h_tile(H, width):
    """Largest H tile (multiple of 8, divides H, >=2 tiles/image) fitting VMEM."""
    if H % 8 != 0:
        return H                                    # whole-image fallback
    cap = min(max(8, H // 2), 512)
    best = 8
    for th in range(8, cap + 1, 8):
        if H % th:
            continue
        need = 4 * ((th + 2) * width * 2 + th * width * 2 + 8 * width)
        if need <= _VMEM_BUDGET:
            best = th
    return best


def _row_tile(rows, k_width, n_width):
    """Largest row tile (multiple of 8, divides rows, <=1024) fitting VMEM."""
    if rows < 8 or rows % 8 != 0:
        return rows
    best = 8
    for tr in range(8, min(rows, 1024) + 1, 8):
        if rows % tr:
            continue
        need = 4 * (tr * k_width * 2 + tr * n_width * 2 + 4 * n_width + k_width * n_width)
        if need <= _VMEM_BUDGET:
            best = tr
    return best


# ----------------------------------------------------------------------------
# K1: depthwise 3x3 (stride 1, SAME) with in-kernel halo + optional fused
#     BN+ReLU pre-op, plus single-pass partial BN stats.
# ----------------------------------------------------------------------------
def _make_dw_kernel(TH, W, C, use_halo, preop):
    WC = W * C

    def kernel(*refs):
        i = 0
        xc_ref = refs[i]; i += 1
        if use_halo:
            xt_ref = refs[i]; i += 1
            xb_ref = refs[i]; i += 1
        if preop:
            sc_ref = refs[i]; i += 1
            sh_ref = refs[i]; i += 1
        dwt_ref = refs[i]; i += 1
        y_ref, s_ref, q_ref = refs[i], refs[i + 1], refs[i + 2]

        t = pl.program_id(1)
        nt = pl.num_programs(1)

        center = xc_ref[...][0].astype(jnp.float32)                # (TH, WC)
        if use_halo:
            top = xt_ref[...][0, 7:8, :].astype(jnp.float32)       # row t*TH-1 (clamped)
            bot = xb_ref[...][0, 0:1, :].astype(jnp.float32)       # row t*TH+TH (clamped)
        else:
            top = jnp.zeros((1, WC), jnp.float32)
            bot = jnp.zeros((1, WC), jnp.float32)
        a = jnp.concatenate([top, center, bot], axis=0)            # (TH+2, WC)

        if preop:  # fused BN2+ReLU of the producing block (applied to real rows)
            a = jnp.maximum(a * sc_ref[...] + sh_ref[...], 0.0)

        # zero rows that fall outside the image (SAME zero padding along H)
        row = jax.lax.broadcasted_iota(jnp.int32, (TH + 2, 1), 0)
        valid = jnp.logical_and(jnp.logical_or(row != 0, t > 0),
                                jnp.logical_or(row != TH + 1, t < nt - 1))
        a = jnp.where(valid, a, 0.0)

        # SAME zero padding along W, built in VMEM only (no HBM padded copy).
        # TODO(synk): evaluate pltpu.roll + lane masks here once verified
        # relayout-free in the bundle dump.
        zc = jnp.zeros((TH + 2, C), jnp.float32)
        aw = jnp.concatenate([zc, a, zc], axis=1)                  # (TH+2, (W+2)*C)

        dwt = dwt_ref[...]                                         # (9, WC)
        acc = jnp.zeros((TH, WC), jnp.float32)
        for kh in range(3):
            for kw in range(3):
                tap = dwt[kh * 3 + kw:kh * 3 + kw + 1, :]          # (1, WC)
                acc = acc + aw[kh:kh + TH, kw * C:kw * C + WC] * tap

        y_ref[...] = acc.reshape(1, TH, WC)
        # single-pass partial BN stats (folded across tiles by the wrapper)
        s_ref[...] = jnp.sum(acc, axis=0).reshape(1, 1, WC)
        q_ref[...] = jnp.sum(acc * acc, axis=0).reshape(1, 1, WC)

    return kernel


def _depthwise(x_slab, dw_taps, W, C, pre_scale=None, pre_shift=None):
    """Depthwise 3x3 on a (N, H, W*C) slab, halo-tiled over (image, H-tile)."""
    N, H, WC = x_slab.shape
    assert WC == W * C
    TH = _h_tile(H, WC)
    nHT = H // TH
    use_halo = (H % 8 == 0) and (nHT > 1)
    preop = pre_scale is not None

    in_specs = [pl.BlockSpec((1, TH, WC), lambda n, t: (n, t, 0))]
    args = [x_slab]
    if use_halo:
        r8 = TH // 8
        nblk8 = H // 8
        in_specs.append(pl.BlockSpec(
            (1, 8, WC), lambda n, t: (n, jnp.maximum(t * r8 - 1, 0), 0)))
        in_specs.append(pl.BlockSpec(
            (1, 8, WC), lambda n, t: (n, jnp.minimum((t + 1) * r8, nblk8 - 1), 0)))
        args += [x_slab, x_slab]
    if preop:
        in_specs += [pl.BlockSpec((1, WC), lambda n, t: (0, 0)),
                     pl.BlockSpec((1, WC), lambda n, t: (0, 0))]
        args += [pre_scale, pre_shift]
    in_specs.append(pl.BlockSpec((9, WC), lambda n, t: (0, 0)))
    args.append(dw_taps)

    y, s, q = pl.pallas_call(
        _make_dw_kernel(TH, W, C, use_halo, preop),
        grid=(N, nHT),
        in_specs=in_specs,
        out_specs=[
            pl.BlockSpec((1, TH, WC), lambda n, t: (n, t, 0)),
            pl.BlockSpec((1, 1, WC), lambda n, t: (n * nHT + t, 0, 0)),
            pl.BlockSpec((1, 1, WC), lambda n, t: (n * nHT + t, 0, 0)),
        ],
        out_shape=[
            jax.ShapeDtypeStruct((N, H, WC), jnp.float32),
            jax.ShapeDtypeStruct((N * nHT, 1, WC), jnp.float32),
            jax.ShapeDtypeStruct((N * nHT, 1, WC), jnp.float32),
        ],
        compiler_params=_compiler_params(2),
    )(*args)
    return y, s, q


# ----------------------------------------------------------------------------
# K2: BN1+ReLU + pointwise 1x1 (MXU matmul) + partial BN2 stats.
# ----------------------------------------------------------------------------
def _pw_kernel(a_ref, sc_ref, sh_ref, w_ref, z_ref, s_ref, q_ref):
    a = jnp.maximum(a_ref[...].astype(jnp.float32) * sc_ref[...] + sh_ref[...], 0.0)
    z = jnp.dot(a, w_ref[...], preferred_element_type=jnp.float32)
    z_ref[...] = z
    s_ref[...] = jnp.sum(z, axis=0).reshape(s_ref.shape)
    q_ref[...] = jnp.sum(z * z, axis=0).reshape(q_ref.shape)


def _pointwise(a2d, scale_row, shift_row, w_mat):
    R, K = a2d.shape
    Nc = w_mat.shape[1]
    TR = _row_tile(R, K, Nc)
    nT = R // TR
    z, s, q = pl.pallas_call(
        _pw_kernel,
        grid=(nT,),
        in_specs=[
            pl.BlockSpec((TR, K), lambda t: (t, 0)),
            pl.BlockSpec((1, K), lambda t: (0, 0)),
            pl.BlockSpec((1, K), lambda t: (0, 0)),
            pl.BlockSpec((K, Nc), lambda t: (0, 0)),
        ],
        out_specs=[
            pl.BlockSpec((TR, Nc), lambda t: (t, 0)),
            pl.BlockSpec((1, 1, Nc), lambda t: (t, 0, 0)),
            pl.BlockSpec((1, 1, Nc), lambda t: (t, 0, 0)),
        ],
        out_shape=[
            jax.ShapeDtypeStruct((R, Nc), jnp.float32),
            jax.ShapeDtypeStruct((nT, 1, Nc), jnp.float32),
            jax.ShapeDtypeStruct((nT, 1, Nc), jnp.float32),
        ],
        compiler_params=_compiler_params(1),
    )(a2d, scale_row, shift_row, w_mat)
    return z, s, q


# ----------------------------------------------------------------------------
# BN stat folding and block composition.
# ----------------------------------------------------------------------------
def _fold_bn(s, q, m, c, w_rep, gamma, beta):
    """Partial (sum, sum-of-squares) tiles -> training-mode BN scale/shift."""
    # TODO(synk): single-pass E[x^2]-mean^2 can cancel for large-mean activations;
    # use a shifted / two-pass reduction for production-scale inputs.
    tot = jnp.sum(s, axis=(0, 1))
    tot2 = jnp.sum(q, axis=(0, 1))
    if w_rep > 1:
        tot = tot.reshape(w_rep, c).sum(axis=0)
        tot2 = tot2.reshape(w_rep, c).sum(axis=0)
    mean = tot / m
    var = tot2 / m - mean * mean
    scale = gamma * jax.lax.rsqrt(var + EPS)
    shift = beta - mean * scale
    return scale, shift


def _dsconv_block(x_slab, W, params, pre_scale, pre_shift):
    """One DepthwiseSeparableConv; its trailing BN2+ReLU is deferred to the caller."""
    dw, g1, b1, pw, g2, b2 = params
    N, H, WCin = x_slab.shape
    Cin = dw.shape[1]
    Cout = pw.shape[1]
    assert WCin == W * Cin
    M = N * H * W

    # depthwise 3x3 (+ fused pre-op) + BN1 partial stats
    dw_taps = jnp.tile(dw, (1, W))                                  # (9, W*Cin)
    y, s1, q1 = _depthwise(x_slab, dw_taps, W, Cin, pre_scale, pre_shift)
    scale1, shift1 = _fold_bn(s1, q1, M, Cin, W, g1, b1)

    WCout = W * Cout
    if WCin <= 128 and WCout <= 128:
        # Small channels: block-diagonal (kron) weight keeps the matmul lane-dense
        # while staying inside a single MXU tile.
        w_mat = jnp.kron(jnp.eye(W, dtype=pw.dtype), pw)            # (W*Cin, W*Cout)
        a2d = y.reshape(N * H, WCin)
        sc = jnp.tile(scale1, W).reshape(1, WCin)
        sh = jnp.tile(shift1, W).reshape(1, WCin)
        z2d, s2, q2 = _pointwise(a2d, sc, sh, w_mat)
        scale2, shift2 = _fold_bn(s2, q2, M, Cout, W, g2, b2)
    else:
        # Large channels: flat (N*H*W, Cin) x (Cin, Cout) matmul; the reshape is a
        # free row-major relabel of the HBM slab (done here, not inside the kernel).
        a2d = y.reshape(N * H * W, Cin)
        z2d, s2, q2 = _pointwise(a2d, scale1.reshape(1, Cin),
                                 shift1.reshape(1, Cin), pw)
        scale2, shift2 = _fold_bn(s2, q2, M, Cout, 1, g2, b2)

    z_slab = z2d.reshape(N, H, WCout)
    sc2 = jnp.tile(scale2, W).reshape(1, WCout)
    sh2 = jnp.tile(shift2, W).reshape(1, WCout)
    return z_slab, sc2, sh2


@jax.jit
def halo_unet_block(x_nchw, params1, params2):
    N, Cin, H, W = x_nchw.shape
    Cout = params2[3].shape[1]
    # NCHW -> channels-last slab (boundary-only transpose)
    x = jnp.transpose(x_nchw, (0, 2, 3, 1)).reshape(N, H, W * Cin)

    z1, sc1, sh1 = _dsconv_block(x, W, params1, None, None)
    # Block 1's BN2+ReLU is fused into block 2's depthwise kernel (pre-op).
    z2, sc2, sh2 = _dsconv_block(z1, W, params2, sc1, sh1)
    # Final BN2+ReLU folded into the output stage (XLA fuses it with the transpose).
    # TODO(synk): optional bf16 intermediate slabs (halves HBM traffic on v5e);
    # kept f32 here for exact parity with the f32 reference.
    out = jnp.maximum(z2 * sc2 + sh2, 0.0)
    return out.reshape(N, H, W, Cout).transpose(0, 3, 1, 2).astype(x_nchw.dtype)


# ----------------------------------------------------------------------------
# Parameter init (PyTorch layouts) and pure-JAX reference.
# ----------------------------------------------------------------------------
def init_dsconv_params(key, cin, cout):
    k1, k2 = jax.random.split(key)
    # PyTorch depthwise weight (cin, 1, 3, 3) -> (9, cin), row-major taps.
    dw_pt = jax.random.normal(k1, (cin, 1, 3, 3), jnp.float32) * 0.1
    dw = dw_pt[:, 0, :, :].reshape(cin, 9).T
    # PyTorch pointwise weight (cout, cin, 1, 1) -> (cin, cout).
    pw_pt = jax.random.normal(k2, (cout, cin, 1, 1), jnp.float32) * 0.1
    pw = pw_pt[:, :, 0, 0].T
    g1 = jnp.ones((cin,), jnp.float32)
    b1 = jnp.zeros((cin,), jnp.float32)
    g2 = jnp.ones((cout,), jnp.float32)
    b2 = jnp.zeros((cout,), jnp.float32)
    return dw, g1, b1, pw, g2, b2


def _ref_dsconv(x_nhwc, dw, g1, b1, pw, g2, b2):
    """Pure-JAX reference (correctness check only)."""
    N, H, W, Cin = x_nhwc.shape
    k = dw.T.reshape(Cin, 3, 3).transpose(1, 2, 0).reshape(3, 3, 1, Cin)
    y = jax.lax.conv_general_dilated(
        x_nhwc, k, (1, 1), 'SAME',
        dimension_numbers=('NHWC', 'HWIO', 'NHWC'),
        feature_group_count=Cin)

    def bn(t, g, b):
        m = jnp.mean(t, axis=(0, 1, 2), keepdims=True)
        v = jnp.mean((t - m) ** 2, axis=(0, 1, 2), keepdims=True)
        return (t - m) / jnp.sqrt(v + EPS) * g.reshape(1, 1, 1, -1) + b.reshape(1, 1, 1, -1)

    y = jnp.maximum(bn(y, g1, b1), 0.0)
    z = jnp.einsum('nhwc,cd->nhwd', y, pw)
    z = jnp.maximum(bn(z, g2, b2), 0.0)
    return z


if __name__ == "__main__":
    key = jax.random.PRNGKey(0)
    kx, kp1, kp2 = jax.random.split(key, 3)

    N, Cin, H, W = 2, 4, 16, 16
    Cout = 8

    x = jax.random.normal(kx, (N, Cin, H, W), jnp.float32)
    params1 = init_dsconv_params(kp1, Cin, Cout)   # conv1: in -> out
    params2 = init_dsconv_params(kp2, Cout, Cout)  # conv2: out -> out

    out = jax.block_until_ready(halo_unet_block(x, params1, params2))

    # Correctness check against a pure-JAX reference.
    xr = jnp.transpose(x, (0, 2, 3, 1))
    ref = _ref_dsconv(_ref_dsconv(xr, *params1), *params2)
    ref = jnp.transpose(ref, (0, 3, 1, 2))

    assert out.shape == (N, Cout, H, W), out.shape
    assert bool(jnp.all(jnp.isfinite(out)))
    err = float(jnp.max(jnp.abs(out - ref)))
    assert err < 1e-3, err

    print("KERNEL_OK")
</pallas_src>

<mosaic_0001>
module attributes {stable_mosaic.version = 11 : i64} {
  func.func @kernel(%arg0: i32, %arg1: i32, %arg2: memref<1x8x64xf32, #tpu.memory_space<vmem>>, %arg3: memref<1x8x64xf32, #tpu.memory_space<vmem>>, %arg4: memref<1x8x64xf32, #tpu.memory_space<vmem>>, %arg5: memref<9x64xf32, #tpu.memory_space<vmem>>, %arg6: memref<1x8x64xf32, #tpu.memory_space<vmem>>, %arg7: memref<1x1x64xf32, #tpu.memory_space<vmem>>, %arg8: memref<1x1x64xf32, #tpu.memory_space<vmem>>) attributes {dimension_semantics = [#tpu.dimension_semantics<parallel>, #tpu.dimension_semantics<parallel>], iteration_bounds = array<i64: 2, 2>, scalar_prefetch = 0 : i64, scratch_operands = 0 : i64, tpu.core_type = #tpu.core_type<tc>, window_params = [{transform_indices = @transform_0, window_bounds = array<i64: 1, 8, 64>}, {transform_indices = @transform_1, window_bounds = array<i64: 1, 8, 64>}, {transform_indices = @transform_2, window_bounds = array<i64: 1, 8, 64>}, {pipeline_mode = #tpu.pipeline_mode<synchronous>, transform_indices = @transform_3, window_bounds = array<i64: 9, 64>}, {transform_indices = @transform_4, window_bounds = array<i64: 1, 8, 64>}, {transform_indices = @transform_5, window_bounds = array<i64: 1, 1, 64>}, {transform_indices = @transform_6, window_bounds = array<i64: 1, 1, 64>}]} {
    %c0 = arith.constant 0 : index
    %c0_0 = arith.constant 0 : index
    %c0_1 = arith.constant 0 : index
    %0 = vector.load %arg2[%c0, %c0_0, %c0_1] : memref<1x8x64xf32, #tpu.memory_space<vmem>>, vector<1x8x64xf32>
    %1 = vector.shape_cast %0 : vector<1x8x64xf32> to vector<8x64xf32>
    %c0_2 = arith.constant 0 : index
    %c0_3 = arith.constant 0 : index
    %c0_4 = arith.constant 0 : index
    %2 = vector.load %arg3[%c0_2, %c0_3, %c0_4] : memref<1x8x64xf32, #tpu.memory_space<vmem>>, vector<1x8x64xf32>
    %3 = vector.extract_strided_slice %2 {offsets = [0, 7, 0], sizes = [1, 1, 64], strides = [1, 1, 1]} : vector<1x8x64xf32> to vector<1x1x64xf32>
    %4 = vector.shape_cast %3 : vector<1x1x64xf32> to vector<1x64xf32>
    %c0_5 = arith.constant 0 : index
    %c0_6 = arith.constant 0 : index
    %c0_7 = arith.constant 0 : index
    %5 = vector.load %arg4[%c0_5, %c0_6, %c0_7] : memref<1x8x64xf32, #tpu.memory_space<vmem>>, vector<1x8x64xf32>
    %6 = vector.extract_strided_slice %5 {offsets = [0, 0, 0], sizes = [1, 1, 64], strides = [1, 1, 1]} : vector<1x8x64xf32> to vector<1x1x64xf32>
    %7 = vector.shape_cast %6 : vector<1x1x64xf32> to vector<1x64xf32>
    %8 = tpu.concatenate %4, %1, %7 in 0 : vector<1x64xf32>, vector<8x64xf32>, vector<1x64xf32> -> vector<10x64xf32>
    %9 = tpu.iota {dimensions = array<i32: 0>} : vector<10x1xi32>
    %c0_i32 = arith.constant 0 : i32
    %10 = vector.broadcast %c0_i32 : i32 to vector<10x1xi32>
    %11 = arith.cmpi ne, %9, %10 : vector<10x1xi32>
    %c0_i32_8 = arith.constant 0 : i32
    %12 = arith.cmpi sgt, %arg1, %c0_i32_8 : i32
    %13 = vector.broadcast %12 : i1 to vector<10x1xi1>
    %14 = arith.ori %11, %13 : vector<10x1xi1>
    %c9_i32 = arith.constant 9 : i32
    %15 = vector.broadcast %c9_i32 : i32 to vector<10x1xi32>
    %16 = arith.cmpi ne, %9, %15 : vector<10x1xi32>
    %c1_i32 = arith.constant 1 : i32
    %17 = arith.cmpi slt, %arg1, %c1_i32 : i32
    %18 = vector.broadcast %17 : i1 to vector<10x1xi1>
    %19 = arith.ori %16, %18 : vector<10x1xi1>
    %20 = arith.andi %14, %19 : vector<10x1xi1>
    %cst = arith.constant 0.000000e+00 : f32
    %21 = vector.shape_cast %20 : vector<10x1xi1> to vector<10x1xi1>
    %22 = vector.broadcast %21 : vector<10x1xi1> to vector<10x64xi1>
    %23 = vector.broadcast %cst : f32 to vector<10x64xf32>
    %24 = arith.select %22, %8, %23 : vector<10x64xi1>, vector<10x64xf32>
    %cst_9 = arith.constant 0.000000e+00 : f32
    %25 = vector.broadcast %cst_9 : f32 to vector<10x4xf32>
    %26 = tpu.concatenate %25, %24, %25 in 1 : vector<10x4xf32>, vector<10x64xf32>, vector<10x4xf32> -> vector<10x72xf32>
    %c0_10 = arith.constant 0 : index
    %c0_11 = arith.constant 0 : index
    %27 = vector.load %arg5[%c0_10, %c0_11] : memref<9x64xf32, #tpu.memory_space<vmem>>, vector<9x64xf32>
    %cst_12 = arith.constant 0.000000e+00 : f32
    %28 = vector.broadcast %cst_12 : f32 to vector<8x64xf32>
    %29 = vector.extract_strided_slice %27 {offsets = [0, 0], sizes = [1, 64], strides = [1, 1]} : vector<9x64xf32> to vector<1x64xf32>
    %30 = vector.extract_strided_slice %26 {offsets = [0, 0], sizes = [8, 64], strides = [1, 1]} : vector<10x72xf32> to vector<8x64xf32>
    %31 = vector.broadcast %29 : vector<1x64xf32> to vector<8x64xf32>
    %32 = arith.mulf %30, %31 : vector<8x64xf32>
    %33 = arith.addf %28, %32 : vector<8x64xf32>
    %34 = vector.extract_strided_slice %27 {offsets = [1, 0], sizes = [1, 64], strides = [1, 1]} : vector<9x64xf32> to vector<1x64xf32>
    %35 = vector.extract_strided_slice %26 {offsets = [0, 4], sizes = [8, 64], strides = [1, 1]} : vector<10x72xf32> to vector<8x64xf32>
    %36 = vector.broadcast %34 : vector<1x64xf32> to vector<8x64xf32>
    %37 = arith.mulf %35, %36 : vector<8x64xf32>
    %38 = arith.addf %33, %37 : vector<8x64xf32>
    %39 = vector.extract_strided_slice %27 {offsets = [2, 0], sizes = [1, 64], strides = [1, 1]} : vector<9x64xf32> to vector<1x64xf32>
    %40 = vector.extract_strided_slice %26 {offsets = [0, 8], sizes = [8, 64], strides = [1, 1]} : vector<10x72xf32> to vector<8x64xf32>
    %41 = vector.broadcast %39 : vector<1x64xf32> to vector<8x64xf32>
    %42 = arith.mulf %40, %41 : vector<8x64xf32>
    %43 = arith.addf %38, %42 : vector<8x64xf32>
    %44 = vector.extract_strided_slice %27 {offsets = [3, 0], sizes = [1, 64], strides = [1, 1]} : vector<9x64xf32> to vector<1x64xf32>
    %45 = vector.extract_strided_slice %26 {offsets = [1, 0], sizes = [8, 64], strides = [1, 1]} : vector<10x72xf32> to vector<8x64xf32>
    %46 = vector.broadcast %44 : vector<1x64xf32> to vector<8x64xf32>
    %47 = arith.mulf %45, %46 : vector<8x64xf32>
    %48 = arith.addf %43, %47 : vector<8x64xf32>
    %49 = vector.extract_strided_slice %27 {offsets = [4, 0], sizes = [1, 64], strides = [1, 1]} : vector<9x64xf32> to vector<1x64xf32>
    %50 = vector.extract_strided_slice %26 {offsets = [1, 4], sizes = [8, 64], strides = [1, 1]} : vector<10x72xf32> to vector<8x64xf32>
    %51 = vector.broadcast %49 : vector<1x64xf32> to vector<8x64xf32>
    %52 = arith.mulf %50, %51 : vector<8x64xf32>
    %53 = arith.addf %48, %52 : vector<8x64xf32>
    %54 = vector.extract_strided_slice %27 {offsets = [5, 0], sizes = [1, 64], strides = [1, 1]} : vector<9x64xf32> to vector<1x64xf32>
    %55 = vector.extract_strided_slice %26 {offsets = [1, 8], sizes = [8, 64], strides = [1, 1]} : vector<10x72xf32> to vector<8x64xf32>
    %56 = vector.broadcast %54 : vector<1x64xf32> to vector<8x64xf32>
    %57 = arith.mulf %55, %56 : vector<8x64xf32>
    %58 = arith.addf %53, %57 : vector<8x64xf32>
    %59 = vector.extract_strided_slice %27 {offsets = [6, 0], sizes = [1, 64], strides = [1, 1]} : vector<9x64xf32> to vector<1x64xf32>
    %60 = vector.extract_strided_slice %26 {offsets = [2, 0], sizes = [8, 64], strides = [1, 1]} : vector<10x72xf32> to vector<8x64xf32>
    %61 = vector.broadcast %59 : vector<1x64xf32> to vector<8x64xf32>
    %62 = arith.mulf %60, %61 : vector<8x64xf32>
    %63 = arith.addf %58, %62 : vector<8x64xf32>
    %64 = vector.extract_strided_slice %27 {offsets = [7, 0], sizes = [1, 64], strides = [1, 1]} : vector<9x64xf32> to vector<1x64xf32>
    %65 = vector.extract_strided_slice %26 {offsets = [2, 4], sizes = [8, 64], strides = [1, 1]} : vector<10x72xf32> to vector<8x64xf32>
    %66 = vector.broadcast %64 : vector<1x64xf32> to vector<8x64xf32>
    %67 = arith.mulf %65, %66 : vector<8x64xf32>
    %68 = arith.addf %63, %67 : vector<8x64xf32>
    %69 = vector.extract_strided_slice %27 {offsets = [8, 0], sizes = [1, 64], strides = [1, 1]} : vector<9x64xf32> to vector<1x64xf32>
    %70 = vector.extract_strided_slice %26 {offsets = [2, 8], sizes = [8, 64], strides = [1, 1]} : vector<10x72xf32> to vector<8x64xf32>
    %71 = vector.broadcast %69 : vector<1x64xf32> to vector<8x64xf32>
    %72 = arith.mulf %70, %71 : vector<8x64xf32>
    %73 = arith.addf %68, %72 : vector<8x64xf32>
    %74 = vector.shape_cast %73 : vector<8x64xf32> to vector<1x8x64xf32>
    %c0_13 = arith.constant 0 : index
    %c0_14 = arith.constant 0 : index
    %c0_15 = arith.constant 0 : index
    %75 = vector.load %arg6[%c0_13, %c0_14, %c0_15] : memref<1x8x64xf32, #tpu.memory_space<vmem>>, vector<1x8x64xf32>
    tpu.vector_store %arg6[%c0_13, %c0_14, %c0_15], %74 {strides = array<i32>} : memref<1x8x64xf32, #tpu.memory_space<vmem>>, vector<1x8x64xf32>,
    %cst_16 = arith.constant dense<0.000000e+00> : vector<64xf32>
    %76 = vector.multi_reduction <add>, %73, %cst_16 [0] : vector<8x64xf32> to vector<64xf32>
    %77 = vector.shape_cast %76 : vector<64xf32> to vector<1x1x64xf32>
    %c0_17 = arith.constant 0 : index
    %c0_18 = arith.constant 0 : index
    %c0_19 = arith.constant 0 : index
    %78 = vector.load %arg7[%c0_17, %c0_18, %c0_19] : memref<1x1x64xf32, #tpu.memory_space<vmem>>, vector<1x1x64xf32>
    tpu.vector_store %arg7[%c0_17, %c0_18, %c0_19], %77 {strides = array<i32>} : memref<1x1x64xf32, #tpu.memory_space<vmem>>, vector<1x1x64xf32>,
    %79 = arith.mulf %73, %73 : vector<8x64xf32>
    %cst_20 = arith.constant dense<0.000000e+00> : vector<64xf32>
    %80 = vector.multi_reduction <add>, %79, %cst_20 [0] : vector<8x64xf32> to vector<64xf32>
    %81 = vector.shape_cast %80 : vector<64xf32> to vector<1x1x64xf32>
    %c0_21 = arith.constant 0 : index
    %c0_22 = arith.constant 0 : index
    %c0_23 = arith.constant 0 : index
    %82 = vector.load %arg8[%c0_21, %c0_22, %c0_23] : memref<1x1x64xf32, #tpu.memory_space<vmem>>, vector<1x1x64xf32>
    tpu.vector_store %arg8[%c0_21, %c0_22, %c0_23], %81 {strides = array<i32>} : memref<1x1x64xf32, #tpu.memory_space<vmem>>, vector<1x1x64xf32>,
    return
  }
  func.func @transform_0(%arg0: i32, %arg1: i32) -> (i32, i32, i32) {
    %c0_i32 = arith.constant 0 : i32
    %c0_i32_0 = arith.constant 0 : i32
    return %arg0, %arg1, %c0_i32 : i32, i32, i32
  }
  func.func @transform_1(%arg0: i32, %arg1: i32) -> (i32, i32, i32) {
    %c1_i32 = arith.constant 1 : i32
    %0 = arith.muli %arg1, %c1_i32 : i32
    %c1_i32_0 = arith.constant 1 : i32
    %1 = arith.subi %0, %c1_i32_0 : i32
    %c0_i32 = arith.constant 0 : i32
    %2 = arith.maxsi %1, %c0_i32 : i32
    %c0_i32_1 = arith.constant 0 : i32
    %c0_i32_2 = arith.constant 0 : i32
    return %arg0, %2, %c0_i32_1 : i32, i32, i32
  }
  func.func @transform_2(%arg0: i32, %arg1: i32) -> (i32, i32, i32) {
    %c1_i32 = arith.constant 1 : i32
    %0 = arith.addi %arg1, %c1_i32 : i32
    %c1_i32_0 = arith.constant 1 : i32
    %1 = arith.muli %0, %c1_i32_0 : i32
    %c1_i32_1 = arith.constant 1 : i32
    %2 = arith.minsi %1, %c1_i32_1 : i32
    %c0_i32 = arith.constant 0 : i32
    %c0_i32_2 = arith.constant 0 : i32
    return %arg0, %2, %c0_i32 : i32, i32, i32
  }
  func.func @transform_3(%arg0: i32, %arg1: i32) -> (i32, i32) {
    %c0_i32 = arith.constant 0 : i32
    %c0_i32_0 = arith.constant 0 : i32
    %c0_i32_1 = arith.constant 0 : i32
    return %c0_i32, %c0_i32_0 : i32, i32
  }
  func.func @transform_4(%arg0: i32, %arg1: i32) -> (i32, i32, i32) {
    %c0_i32 = arith.constant 0 : i32
    %c0_i32_0 = arith.constant 0 : i32
    return %arg0, %arg1, %c0_i32 : i32, i32, i32
  }
  func.func @transform_5(%arg0: i32, %arg1: i32) -> (i32, i32, i32) {
    %c2_i32 = arith.constant 2 : i32
    %0 = arith.muli %arg0, %c2_i32 : i32
    %1 = arith.addi %0, %arg1 : i32
    %c0_i32 = arith.constant 0 : i32
    %c0_i32_0 = arith.constant 0 : i32
    %c0_i32_1 = arith.constant 0 : i32
    return %1, %c0_i32, %c0_i32_0 : i32, i32, i32
  }
  func.func @transform_6(%arg0: i32, %arg1: i32) -> (i32, i32, i32) {
    %c2_i32 = arith.constant 2 : i32
    %0 = arith.muli %arg0, %c2_i32 : i32
    %1 = arith.addi %0, %arg1 : i32
    %c0_i32 = arith.constant 0 : i32
    %c0_i32_0 = arith.constant 0 : i32
    %c0_i32_1 = arith.constant 0 : i32
    return %1, %c0_i32, %c0_i32_0 : i32, i32, i32
  }
}

module attributes {stable_mosaic.version = 11 : i64} {
  func.func @_pw_kernel(%arg0: i32, %arg1: memref<32x64xf32, #tpu.memory_space<vmem>>, %arg2: memref<1x64xf32, #tpu.memory_space<vmem>>, %arg3: memref<1x64xf32, #tpu.memory_space<vmem>>, %arg4: memref<64x128xf32, #tpu.memory_space<vmem>>, %arg5: memref<32x128xf32, #tpu.memory_space<vmem>>, %arg6: memref<1x1x128xf32, #tpu.memory_space<vmem>>, %arg7: memref<1x1x128xf32, #tpu.memory_space<vmem>>) attributes {dimension_semantics = [#tpu.dimension_semantics<parallel>], iteration_bounds = array<i64: 1>, scalar_prefetch = 0 : i64, scratch_operands = 0 : i64, tpu.core_type = #tpu.core_type<tc>, window_params = [{transform_indices = @transform_0, window_bounds = array<i64: 32, 64>}, {pipeline_mode = #tpu.pipeline_mode<synchronous>, transform_indices = @transform_1, window_bounds = array<i64: 1, 64>}, {pipeline_mode = #tpu.pipeline_mode<synchronous>, transform_indices = @transform_2, window_bounds = array<i64: 1, 64>}, {pipeline_mode = #tpu.pipeline_mode<synchronous>, transform_indices = @transform_3, window_bounds = array<i64: 64, 128>}, {transform_indices = @transform_4, window_bounds = array<i64: 32, 128>}, {transform_indices = @transform_5, window_bounds = array<i64: 1, 1, 128>}, {transform_indices = @transform_6, window_bounds = array<i64: 1, 1, 128>}]} {
    %c0 = arith.constant 0 : index
    %c0_0 = arith.constant 0 : index
    %0 = vector.load %arg1[%c0, %c0_0] : memref<32x64xf32, #tpu.memory_space<vmem>>, vector<32x64xf32>
    %c0_1 = arith.constant 0 : index
    %c0_2 = arith.constant 0 : index
    %1 = vector.load %arg2[%c0_1, %c0_2] : memref<1x64xf32, #tpu.memory_space<vmem>>, vector<1x64xf32>
    %2 = vector.broadcast %1 : vector<1x64xf32> to vector<32x64xf32>
    %3 = arith.mulf %0, %2 : vector<32x64xf32>
    %c0_3 = arith.constant 0 : index
    %c0_4 = arith.constant 0 : index
    %4 = vector.load %arg3[%c0_3, %c0_4] : memref<1x64xf32, #tpu.memory_space<vmem>>, vector<1x64xf32>
    %5 = vector.broadcast %4 : vector<1x64xf32> to vector<32x64xf32>
    %6 = arith.addf %3, %5 : vector<32x64xf32>
    %cst = arith.constant 0.000000e+00 : f32
    %7 = vector.broadcast %cst : f32 to vector<32x64xf32>
    %8 = arith.maximumf %6, %7 : vector<32x64xf32>
    %c0_5 = arith.constant 0 : index
    %c0_6 = arith.constant 0 : index
    %9 = vector.load %arg4[%c0_5, %c0_6] : memref<64x128xf32, #tpu.memory_space<vmem>>, vector<64x128xf32>
    %cst_7 = arith.constant dense<0.000000e+00> : vector<32x128xf32>
    %10 = tpu.matmul %8, %9, %cst_7 {dimension_numbers = #tpu.dot_dimension_numbers<[1], [0], [0], [1], [0, 0, 1, 1], [], []>} : vector<32x64xf32>, vector<64x128xf32>, vector<32x128xf32> -> vector<32x128xf32>
    %c0_8 = arith.constant 0 : index
    %c0_9 = arith.constant 0 : index
    %11 = vector.load %arg5[%c0_8, %c0_9] : memref<32x128xf32, #tpu.memory_space<vmem>>, vector<32x128xf32>
    tpu.vector_store %arg5[%c0_8, %c0_9], %10 {strides = array<i32>} : memref<32x128xf32, #tpu.memory_space<vmem>>, vector<32x128xf32>,
    %cst_10 = arith.constant dense<0.000000e+00> : vector<128xf32>
    %12 = vector.multi_reduction <add>, %10, %cst_10 [0] : vector<32x128xf32> to vector<128xf32>
    %13 = vector.shape_cast %12 : vector<128xf32> to vector<1x1x128xf32>
    %c0_11 = arith.constant 0 : index
    %c0_12 = arith.constant 0 : index
    %c0_13 = arith.constant 0 : index
    %14 = vector.load %arg6[%c0_11, %c0_12, %c0_13] : memref<1x1x128xf32, #tpu.memory_space<vmem>>, vector<1x1x128xf32>
    tpu.vector_store %arg6[%c0_11, %c0_12, %c0_13], %13 {strides = array<i32>} : memref<1x1x128xf32, #tpu.memory_space<vmem>>, vector<1x1x128xf32>,
    %15 = arith.mulf %10, %10 : vector<32x128xf32>
    %cst_14 = arith.constant dense<0.000000e+00> : vector<128xf32>
    %16 = vector.multi_reduction <add>, %15, %cst_14 [0] : vector<32x128xf32> to vector<128xf32>
    %17 = vector.shape_cast %16 : vector<128xf32> to vector<1x1x128xf32>
    %c0_15 = arith.constant 0 : index
    %c0_16 = arith.constant 0 : index
    %c0_17 = arith.constant 0 : index
    %18 = vector.load %arg7[%c0_15, %c0_16, %c0_17] : memref<1x1x128xf32, #tpu.memory_space<vmem>>, vector<1x1x128xf32>
    tpu.vector_store %arg7[%c0_15, %c0_16, %c0_17], %17 {strides = array<i32>} : memref<1x1x128xf32, #tpu.memory_space<vmem>>, vector<1x1x128xf32>,
    return
  }
  func.func @transform_0(%arg0: i32) -> (i32, i32) {
    %c0_i32 = arith.constant 0 : i32
    %c0_i32_0 = arith.constant 0 : i32
    return %arg0, %c0_i32 : i32, i32
  }
  func.func @transform_1(%arg0: i32) -> (i32, i32) {
    %c0_i32 = arith.constant 0 : i32
    %c0_i32_0 = arith.constant 0 : i32
    %c0_i32_1 = arith.constant 0 : i32
    return %c0_i32, %c0_i32_0 : i32, i32
  }
  func.func @transform_2(%arg0: i32) -> (i32, i32) {
    %c0_i32 = arith.constant 0 : i32
    %c0_i32_0 = arith.constant 0 : i32
    %c0_i32_1 = arith.constant 0 : i32
    return %c0_i32, %c0_i32_0 : i32, i32
  }
  func.func @transform_3(%arg0: i32) -> (i32, i32) {
    %c0_i32 = arith.constant 0 : i32
    %c0_i32_0 = arith.constant 0 : i32
    %c0_i32_1 = arith.constant 0 : i32
    return %c0_i32, %c0_i32_0 : i32, i32
  }
  func.func @transform_4(%arg0: i32) -> (i32, i32) {
    %c0_i32 = arith.constant 0 : i32
    %c0_i32_0 = arith.constant 0 : i32
    return %arg0, %c0_i32 : i32, i32
  }
  func.func @transform_5(%arg0: i32) -> (i32, i32, i32) {
    %c0_i32 = arith.constant 0 : i32
    %c0_i32_0 = arith.constant 0 : i32
    %c0_i32_1 = arith.constant 0 : i32
    return %arg0, %c0_i32, %c0_i32_0 : i32, i32, i32
  }
  func.func @transform_6(%arg0: i32) -> (i32, i32, i32) {
    %c0_i32 = arith.constant 0 : i32
    %c0_i32_0 = arith.constant 0 : i32
    %c0_i32_1 = arith.constant 0 : i32
    return %arg0, %c0_i32, %c0_i32_0 : i32, i32, i32
  }
}

module attributes {stable_mosaic.version = 11 : i64} {
  func.func @kernel(%arg0: i32, %arg1: i32, %arg2: memref<1x8x128xf32, #tpu.memory_space<vmem>>, %arg3: memref<1x8x128xf32, #tpu.memory_space<vmem>>, %arg4: memref<1x8x128xf32, #tpu.memory_space<vmem>>, %arg5: memref<1x128xf32, #tpu.memory_space<vmem>>, %arg6: memref<1x128xf32, #tpu.memory_space<vmem>>, %arg7: memref<9x128xf32, #tpu.memory_space<vmem>>, %arg8: memref<1x8x128xf32, #tpu.memory_space<vmem>>, %arg9: memref<1x1x128xf32, #tpu.memory_space<vmem>>, %arg10: memref<1x1x128xf32, #tpu.memory_space<vmem>>) attributes {dimension_semantics = [#tpu.dimension_semantics<parallel>, #tpu.dimension_semantics<parallel>], iteration_bounds = array<i64: 2, 2>, scalar_prefetch = 0 : i64, scratch_operands = 0 : i64, tpu.core_type = #tpu.core_type<tc>, window_params = [{transform_indices = @transform_0, window_bounds = array<i64: 1, 8, 128>}, {transform_indices = @transform_1, window_bounds = array<i64: 1, 8, 128>}, {transform_indices = @transform_2, window_bounds = array<i64: 1, 8, 128>}, {pipeline_mode = #tpu.pipeline_mode<synchronous>, transform_indices = @transform_3, window_bounds = array<i64: 1, 128>}, {pipeline_mode = #tpu.pipeline_mode<synchronous>, transform_indices = @transform_4, window_bounds = array<i64: 1, 128>}, {pipeline_mode = #tpu.pipeline_mode<synchronous>, transform_indices = @transform_5, window_bounds = array<i64: 9, 128>}, {transform_indices = @transform_6, window_bounds = array<i64: 1, 8, 128>}, {transform_indices = @transform_7, window_bounds = array<i64: 1, 1, 128>}, {transform_indices = @transform_8, window_bounds = array<i64: 1, 1, 128>}]} {
    %c0 = arith.constant 0 : index
    %c0_0 = arith.constant 0 : index
    %c0_1 = arith.constant 0 : index
    %0 = vector.load %arg2[%c0, %c0_0, %c0_1] : memref<1x8x128xf32, #tpu.memory_space<vmem>>, vector<1x8x128xf32>
    %1 = vector.shape_cast %0 : vector<1x8x128xf32> to vector<8x128xf32>
    %c0_2 = arith.constant 0 : index
    %c0_3 = arith.constant 0 : index
    %c0_4 = arith.constant 0 : index
    %2 = vector.load %arg3[%c0_2, %c0_3, %c0_4] : memref<1x8x128xf32, #tpu.memory_space<vmem>>, vector<1x8x128xf32>
    %3 = vector.extract_strided_slice %2 {offsets = [0, 7, 0], sizes = [1, 1, 128], strides = [1, 1, 1]} : vector<1x8x128xf32> to vector<1x1x128xf32>
    %4 = vector.shape_cast %3 : vector<1x1x128xf32> to vector<1x128xf32>
    %c0_5 = arith.constant 0 : index
    %c0_6 = arith.constant 0 : index
    %c0_7 = arith.constant 0 : index
    %5 = vector.load %arg4[%c0_5, %c0_6, %c0_7] : memref<1x8x128xf32, #tpu.memory_space<vmem>>, vector<1x8x128xf32>
    %6 = vector.extract_strided_slice %5 {offsets = [0, 0, 0], sizes = [1, 1, 128], strides = [1, 1, 1]} : vector<1x8x128xf32> to vector<1x1x128xf32>
    %7 = vector.shape_cast %6 : vector<1x1x128xf32> to vector<1x128xf32>
    %8 = tpu.concatenate %4, %1, %7 in 0 : vector<1x128xf32>, vector<8x128xf32>, vector<1x128xf32> -> vector<10x128xf32>
    %c0_8 = arith.constant 0 : index
    %c0_9 = arith.constant 0 : index
    %9 = vector.load %arg5[%c0_8, %c0_9] : memref<1x128xf32, #tpu.memory_space<vmem>>, vector<1x128xf32>
    %10 = vector.broadcast %9 : vector<1x128xf32> to vector<10x128xf32>
    %11 = arith.mulf %8, %10 : vector<10x128xf32>
    %c0_10 = arith.constant 0 : index
    %c0_11 = arith.constant 0 : index
    %12 = vector.load %arg6[%c0_10, %c0_11] : memref<1x128xf32, #tpu.memory_space<vmem>>, vector<1x128xf32>
    %13 = vector.broadcast %12 : vector<1x128xf32> to vector<10x128xf32>
    %14 = arith.addf %11, %13 : vector<10x128xf32>
    %cst = arith.constant 0.000000e+00 : f32
    %15 = vector.broadcast %cst : f32 to vector<10x128xf32>
    %16 = arith.maximumf %14, %15 : vector<10x128xf32>
    %17 = tpu.iota {dimensions = array<i32: 0>} : vector<10x1xi32>
    %c0_i32 = arith.constant 0 : i32
    %18 = vector.broadcast %c0_i32 : i32 to vector<10x1xi32>
    %19 = arith.cmpi ne, %17, %18 : vector<10x1xi32>
    %c0_i32_12 = arith.constant 0 : i32
    %20 = arith.cmpi sgt, %arg1, %c0_i32_12 : i32
    %21 = vector.broadcast %20 : i1 to vector<10x1xi1>
    %22 = arith.ori %19, %21 : vector<10x1xi1>
    %c9_i32 = arith.constant 9 : i32
    %23 = vector.broadcast %c9_i32 : i32 to vector<10x1xi32>
    %24 = arith.cmpi ne, %17, %23 : vector<10x1xi32>
    %c1_i32 = arith.constant 1 : i32
    %25 = arith.cmpi slt, %arg1, %c1_i32 : i32
    %26 = vector.broadcast %25 : i1 to vector<10x1xi1>
    %27 = arith.ori %24, %26 : vector<10x1xi1>
    %28 = arith.andi %22, %27 : vector<10x1xi1>
    %cst_13 = arith.constant 0.000000e+00 : f32
    %29 = vector.shape_cast %28 : vector<10x1xi1> to vector<10x1xi1>
    %30 = vector.broadcast %29 : vector<10x1xi1> to vector<10x128xi1>
    %31 = vector.broadcast %cst_13 : f32 to vector<10x128xf32>
    %32 = arith.select %30, %16, %31 : vector<10x128xi1>, vector<10x128xf32>
    %cst_14 = arith.constant 0.000000e+00 : f32
    %33 = vector.broadcast %cst_14 : f32 to vector<10x8xf32>
    %34 = tpu.concatenate %33, %32, %33 in 1 : vector<10x8xf32>, vector<10x128xf32>, vector<10x8xf32> -> vector<10x144xf32>
    %c0_15 = arith.constant 0 : index
    %c0_16 = arith.constant 0 : index
    %35 = vector.load %arg7[%c0_15, %c0_16] : memref<9x128xf32, #tpu.memory_space<vmem>>, vector<9x128xf32>
    %cst_17 = arith.constant 0.000000e+00 : f32
    %36 = vector.broadcast %cst_17 : f32 to vector<8x128xf32>
    %37 = vector.extract_strided_slice %35 {offsets = [0, 0], sizes = [1, 128], strides = [1, 1]} : vector<9x128xf32> to vector<1x128xf32>
    %38 = vector.extract_strided_slice %34 {offsets = [0, 0], sizes = [8, 128], strides = [1, 1]} : vector<10x144xf32> to vector<8x128xf32>
    %39 = vector.broadcast %37 : vector<1x128xf32> to vector<8x128xf32>
    %40 = arith.mulf %38, %39 : vector<8x128xf32>
    %41 = arith.addf %36, %40 : vector<8x128xf32>
    %42 = vector.extract_strided_slice %35 {offsets = [1, 0], sizes = [1, 128], strides = [1, 1]} : vector<9x128xf32> to vector<1x128xf32>
    %43 = vector.extract_strided_slice %34 {offsets = [0, 8], sizes = [8, 128], strides = [1, 1]} : vector<10x144xf32> to vector<8x128xf32>
    %44 = vector.broadcast %42 : vector<1x128xf32> to vector<8x128xf32>
    %45 = arith.mulf %43, %44 : vector<8x128xf32>
    %46 = arith.addf %41, %45 : vector<8x128xf32>
    %47 = vector.extract_strided_slice %35 {offsets = [2, 0], sizes = [1, 128], strides = [1, 1]} : vector<9x128xf32> to vector<1x128xf32>
    %48 = vector.extract_strided_slice %34 {offsets = [0, 16], sizes = [8, 128], strides = [1, 1]} : vector<10x144xf32> to vector<8x128xf32>
    %49 = vector.broadcast %47 : vector<1x128xf32> to vector<8x128xf32>
    %50 = arith.mulf %48, %49 : vector<8x128xf32>
    %51 = arith.addf %46, %50 : vector<8x128xf32>
    %52 = vector.extract_strided_slice %35 {offsets = [3, 0], sizes = [1, 128], strides = [1, 1]} : vector<9x128xf32> to vector<1x128xf32>
    %53 = vector.extract_strided_slice %34 {offsets = [1, 0], sizes = [8, 128], strides = [1, 1]} : vector<10x144xf32> to vector<8x128xf32>
    %54 = vector.broadcast %52 : vector<1x128xf32> to vector<8x128xf32>
    %55 = arith.mulf %53, %54 : vector<8x128xf32>
    %56 = arith.addf %51, %55 : vector<8x128xf32>
    %57 = vector.extract_strided_slice %35 {offsets = [4, 0], sizes = [1, 128], strides = [1, 1]} : vector<9x128xf32> to vector<1x128xf32>
    %58 = vector.extract_strided_slice %34 {offsets = [1, 8], sizes = [8, 128], strides = [1, 1]} : vector<10x144xf32> to vector<8x128xf32>
    %59 = vector.broadcast %57 : vector<1x128xf32> to vector<8x128xf32>
    %60 = arith.mulf %58, %59 : vector<8x128xf32>
    %61 = arith.addf %56, %60 : vector<8x128xf32>
    %62 = vector.extract_strided_slice %35 {offsets = [5, 0], sizes = [1, 128], strides = [1, 1]} : vector<9x128xf32> to vector<1x128xf32>
    %63 = vector.extract_strided_slice %34 {offsets = [1, 16], sizes = [8, 128], strides = [1, 1]} : vector<10x144xf32> to vector<8x128xf32>
    %64 = vector.broadcast %62 : vector<1x128xf32> to vector<8x128xf32>
    %65 = arith.mulf %63, %64 : vector<8x128xf32>
    %66 = arith.addf %61, %65 : vector<8x128xf32>
    %67 = vector.extract_strided_slice %35 {offsets = [6, 0], sizes = [1, 128], strides = [1, 1]} : vector<9x128xf32> to vector<1x128xf32>
    %68 = vector.extract_strided_slice %34 {offsets = [2, 0], sizes = [8, 128], strides = [1, 1]} : vector<10x144xf32> to vector<8x128xf32>
    %69 = vector.broadcast %67 : vector<1x128xf32> to vector<8x128xf32>
    %70 = arith.mulf %68, %69 : vector<8x128xf32>
    %71 = arith.addf %66, %70 : vector<8x128xf32>
    %72 = vector.extract_strided_slice %35 {offsets = [7, 0], sizes = [1, 128], strides = [1, 1]} : vector<9x128xf32> to vector<1x128xf32>
    %73 = vector.extract_strided_slice %34 {offsets = [2, 8], sizes = [8, 128], strides = [1, 1]} : vector<10x144xf32> to vector<8x128xf32>
    %74 = vector.broadcast %72 : vector<1x128xf32> to vector<8x128xf32>
    %75 = arith.mulf %73, %74 : vector<8x128xf32>
    %76 = arith.addf %71, %75 : vector<8x128xf32>
    %77 = vector.extract_strided_slice %35 {offsets = [8, 0], sizes = [1, 128], strides = [1, 1]} : vector<9x128xf32> to vector<1x128xf32>
    %78 = vector.extract_strided_slice %34 {offsets = [2, 16], sizes = [8, 128], strides = [1, 1]} : vector<10x144xf32> to vector<8x128xf32>
    %79 = vector.broadcast %77 : vector<1x128xf32> to vector<8x128xf32>
    %80 = arith.mulf %78, %79 : vector<8x128xf32>
    %81 = arith.addf %76, %80 : vector<8x128xf32>
    %82 = vector.shape_cast %81 : vector<8x128xf32> to vector<1x8x128xf32>
    %c0_18 = arith.constant 0 : index
    %c0_19 = arith.constant 0 : index
    %c0_20 = arith.constant 0 : index
    %83 = vector.load %arg8[%c0_18, %c0_19, %c0_20] : memref<1x8x128xf32, #tpu.memory_space<vmem>>, vector<1x8x128xf32>
    tpu.vector_store %arg8[%c0_18, %c0_19, %c0_20], %82 {strides = array<i32>} : memref<1x8x128xf32, #tpu.memory_space<vmem>>, vector<1x8x128xf32>,
    %cst_21 = arith.constant dense<0.000000e+00> : vector<128xf32>
    %84 = vector.multi_reduction <add>, %81, %cst_21 [0] : vector<8x128xf32> to vector<128xf32>
    %85 = vector.shape_cast %84 : vector<128xf32> to vector<1x1x128xf32>
    %c0_22 = arith.constant 0 : index
    %c0_23 = arith.constant 0 : index
    %c0_24 = arith.constant 0 : index
    %86 = vector.load %arg9[%c0_22, %c0_23, %c0_24] : memref<1x1x128xf32, #tpu.memory_space<vmem>>, vector<1x1x128xf32>
    tpu.vector_store %arg9[%c0_22, %c0_23, %c0_24], %85 {strides = array<i32>} : memref<1x1x128xf32, #tpu.memory_space<vmem>>, vector<1x1x128xf32>,
    %87 = arith.mulf %81, %81 : vector<8x128xf32>
    %cst_25 = arith.constant dense<0.000000e+00> : vector<128xf32>
    %88 = vector.multi_reduction <add>, %87, %cst_25 [0] : vector<8x128xf32> to vector<128xf32>
    %89 = vector.shape_cast %88 : vector<128xf32> to vector<1x1x128xf32>
    %c0_26 = arith.constant 0 : index
    %c0_27 = arith.constant 0 : index
    %c0_28 = arith.constant 0 : index
    %90 = vector.load %arg10[%c0_26, %c0_27, %c0_28] : memref<1x1x128xf32, #tpu.memory_space<vmem>>, vector<1x1x128xf32>
    tpu.vector_store %arg10[%c0_26, %c0_27, %c0_28], %89 {strides = array<i32>} : memref<1x1x128xf32, #tpu.memory_space<vmem>>, vector<1x1x128xf32>,
    return
  }
  func.func @transform_0(%arg0: i32, %arg1: i32) -> (i32, i32, i32) {
    %c0_i32 = arith.constant 0 : i32
    %c0_i32_0 = arith.constant 0 : i32
    return %arg0, %arg1, %c0_i32 : i32, i32, i32
  }
  func.func @transform_1(%arg0: i32, %arg1: i32) -> (i32, i32, i32) {
    %c1_i32 = arith.constant 1 : i32
    %0 = arith.muli %arg1, %c1_i32 : i32
    %c1_i32_0 = arith.constant 1 : i32
    %1 = arith.subi %0, %c1_i32_0 : i32
    %c0_i32 = arith.constant 0 : i32
    %2 = arith.maxsi %1, %c0_i32 : i32
    %c0_i32_1 = arith.constant 0 : i32
    %c0_i32_2 = arith.constant 0 : i32
    return %arg0, %2, %c0_i32_1 : i32, i32, i32
  }
  func.func @transform_2(%arg0: i32, %arg1: i32) -> (i32, i32, i32) {
    %c1_i32 = arith.constant 1 : i32
    %0 = arith.addi %arg1, %c1_i32 : i32
    %c1_i32_0 = arith.constant 1 : i32
    %1 = arith.muli %0, %c1_i32_0 : i32
    %c1_i32_1 = arith.constant 1 : i32
    %2 = arith.minsi %1, %c1_i32_1 : i32
    %c0_i32 = arith.constant 0 : i32
    %c0_i32_2 = arith.constant 0 : i32
    return %arg0, %2, %c0_i32 : i32, i32, i32
  }
  func.func @transform_3(%arg0: i32, %arg1: i32) -> (i32, i32) {
    %c0_i32 = arith.constant 0 : i32
    %c0_i32_0 = arith.constant 0 : i32
    %c0_i32_1 = arith.constant 0 : i32
    return %c0_i32, %c0_i32_0 : i32, i32
  }
  func.func @transform_4(%arg0: i32, %arg1: i32) -> (i32, i32) {
    %c0_i32 = arith.constant 0 : i32
    %c0_i32_0 = arith.constant 0 : i32
    %c0_i32_1 = arith.constant 0 : i32
    return %c0_i32, %c0_i32_0 : i32, i32
  }
  func.func @transform_5(%arg0: i32, %arg1: i32) -> (i32, i32) {
    %c0_i32 = arith.constant 0 : i32
    %c0_i32_0 = arith.constant 0 : i32
    %c0_i32_1 = arith.constant 0 : i32
    return %c0_i32, %c0_i32_0 : i32, i32
  }
  func.func @transform_6(%arg0: i32, %arg1: i32) -> (i32, i32, i32) {
    %c0_i32 = arith.constant 0 : i32
    %c0_i32_0 = arith.constant 0 : i32
    return %arg0, %arg1, %c0_i32 : i32, i32, i32
  }
  func.func @transform_7(%arg0: i32, %arg1: i32) -> (i32, i32, i32) {
    %c2_i32 = arith.constant 2 : i32
    %0 = arith.muli %arg0, %c2_i32 : i32
    %1 = arith.addi %0, %arg1 : i32
    %c0_i32 = arith.constant 0 : i32
    %c0_i32_0 = arith.constant 0 : i32
    %c0_i32_1 = arith.constant 0 : i32
    return %1, %c0_i32, %c0_i32_0 : i32, i32, i32
  }
  func.func @transform_8(%arg0: i32, %arg1: i32) -> (i32, i32, i32) {
    %c2_i32 = arith.constant 2 : i32
    %0 = arith.muli %arg0, %c2_i32 : i32
    %1 = arith.addi %0, %arg1 : i32
    %c0_i32 = arith.constant 0 : i32
    %c0_i32_0 = arith.constant 0 : i32
    %c0_i32_1 = arith.constant 0 : i32
    return %1, %c0_i32, %c0_i32_0 : i32, i32, i32
  }
}

module attributes {stable_mosaic.version = 11 : i64} {
  func.func @_pw_kernel(%arg0: i32, %arg1: memref<32x128xf32, #tpu.memory_space<vmem>>, %arg2: memref<1x128xf32, #tpu.memory_space<vmem>>, %arg3: memref<1x128xf32, #tpu.memory_space<vmem>>, %arg4: memref<128x128xf32, #tpu.memory_space<vmem>>, %arg5: memref<32x128xf32, #tpu.memory_space<vmem>>, %arg6: memref<1x1x128xf32, #tpu.memory_space<vmem>>, %arg7: memref<1x1x128xf32, #tpu.memory_space<vmem>>) attributes {dimension_semantics = [#tpu.dimension_semantics<parallel>], iteration_bounds = array<i64: 1>, scalar_prefetch = 0 : i64, scratch_operands = 0 : i64, tpu.core_type = #tpu.core_type<tc>, window_params = [{transform_indices = @transform_0, window_bounds = array<i64: 32, 128>}, {pipeline_mode = #tpu.pipeline_mode<synchronous>, transform_indices = @transform_1, window_bounds = array<i64: 1, 128>}, {pipeline_mode = #tpu.pipeline_mode<synchronous>, transform_indices = @transform_2, window_bounds = array<i64: 1, 128>}, {pipeline_mode = #tpu.pipeline_mode<synchronous>, transform_indices = @transform_3, window_bounds = array<i64: 128, 128>}, {transform_indices = @transform_4, window_bounds = array<i64: 32, 128>}, {transform_indices = @transform_5, window_bounds = array<i64: 1, 1, 128>}, {transform_indices = @transform_6, window_bounds = array<i64: 1, 1, 128>}]} {
    %c0 = arith.constant 0 : index
    %c0_0 = arith.constant 0 : index
    %0 = vector.load %arg1[%c0, %c0_0] : memref<32x128xf32, #tpu.memory_space<vmem>>, vector<32x128xf32>
    %c0_1 = arith.constant 0 : index
    %c0_2 = arith.constant 0 : index
    %1 = vector.load %arg2[%c0_1, %c0_2] : memref<1x128xf32, #tpu.memory_space<vmem>>, vector<1x128xf32>
    %2 = vector.broadcast %1 : vector<1x128xf32> to vector<32x128xf32>
    %3 = arith.mulf %0, %2 : vector<32x128xf32>
    %c0_3 = arith.constant 0 : index
    %c0_4 = arith.constant 0 : index
    %4 = vector.load %arg3[%c0_3, %c0_4] : memref<1x128xf32, #tpu.memory_space<vmem>>, vector<1x128xf32>
    %5 = vector.broadcast %4 : vector<1x128xf32> to vector<32x128xf32>
    %6 = arith.addf %3, %5 : vector<32x128xf32>
    %cst = arith.constant 0.000000e+00 : f32
    %7 = vector.broadcast %cst : f32 to vector<32x128xf32>
    %8 = arith.maximumf %6, %7 : vector<32x128xf32>
    %c0_5 = arith.constant 0 : index
    %c0_6 = arith.constant 0 : index
    %9 = vector.load %arg4[%c0_5, %c0_6] : memref<128x128xf32, #tpu.memory_space<vmem>>, vector<128x128xf32>
    %cst_7 = arith.constant dense<0.000000e+00> : vector<32x128xf32>
    %10 = tpu.matmul %8, %9, %cst_7 {dimension_numbers = #tpu.dot_dimension_numbers<[1], [0], [0], [1], [0, 0, 1, 1], [], []>} : vector<32x128xf32>, vector<128x128xf32>, vector<32x128xf32> -> vector<32x128xf32>
    %c0_8 = arith.constant 0 : index
    %c0_9 = arith.constant 0 : index
    %11 = vector.load %arg5[%c0_8, %c0_9] : memref<32x128xf32, #tpu.memory_space<vmem>>, vector<32x128xf32>
    tpu.vector_store %arg5[%c0_8, %c0_9], %10 {strides = array<i32>} : memref<32x128xf32, #tpu.memory_space<vmem>>, vector<32x128xf32>,
    %cst_10 = arith.constant dense<0.000000e+00> : vector<128xf32>
    %12 = vector.multi_reduction <add>, %10, %cst_10 [0] : vector<32x128xf32> to vector<128xf32>
    %13 = vector.shape_cast %12 : vector<128xf32> to vector<1x1x128xf32>
    %c0_11 = arith.constant 0 : index
    %c0_12 = arith.constant 0 : index
    %c0_13 = arith.constant 0 : index
    %14 = vector.load %arg6[%c0_11, %c0_12, %c0_13] : memref<1x1x128xf32, #tpu.memory_space<vmem>>, vector<1x1x128xf32>
    tpu.vector_store %arg6[%c0_11, %c0_12, %c0_13], %13 {strides = array<i32>} : memref<1x1x128xf32, #tpu.memory_space<vmem>>, vector<1x1x128xf32>,
    %15 = arith.mulf %10, %10 : vector<32x128xf32>
    %cst_14 = arith.constant dense<0.000000e+00> : vector<128xf32>
    %16 = vector.multi_reduction <add>, %15, %cst_14 [0] : vector<32x128xf32> to vector<128xf32>
    %17 = vector.shape_cast %16 : vector<128xf32> to vector<1x1x128xf32>
    %c0_15 = arith.constant 0 : index
    %c0_16 = arith.constant 0 : index
    %c0_17 = arith.constant 0 : index
    %18 = vector.load %arg7[%c0_15, %c0_16, %c0_17] : memref<1x1x128xf32, #tpu.memory_space<vmem>>, vector<1x1x128xf32>
    tpu.vector_store %arg7[%c0_15, %c0_16, %c0_17], %17 {strides = array<i32>} : memref<1x1x128xf32, #tpu.memory_space<vmem>>, vector<1x1x128xf32>,
    return
  }
  func.func @transform_0(%arg0: i32) -> (i32, i32) {
    %c0_i32 = arith.constant 0 : i32
    %c0_i32_0 = arith.constant 0 : i32
    return %arg0, %c0_i32 : i32, i32
  }
  func.func @transform_1(%arg0: i32) -> (i32, i32) {
    %c0_i32 = arith.constant 0 : i32
    %c0_i32_0 = arith.constant 0 : i32
    %c0_i32_1 = arith.constant 0 : i32
    return %c0_i32, %c0_i32_0 : i32, i32
  }
  func.func @transform_2(%arg0: i32) -> (i32, i32) {
    %c0_i32 = arith.constant 0 : i32
    %c0_i32_0 = arith.constant 0 : i32
    %c0_i32_1 = arith.constant 0 : i32
    return %c0_i32, %c0_i32_0 : i32, i32
  }
  func.func @transform_3(%arg0: i32) -> (i32, i32) {
    %c0_i32 = arith.constant 0 : i32
    %c0_i32_0 = arith.constant 0 : i32
    %c0_i32_1 = arith.constant 0 : i32
    return %c0_i32, %c0_i32_0 : i32, i32
  }
  func.func @transform_4(%arg0: i32) -> (i32, i32) {
    %c0_i32 = arith.constant 0 : i32
    %c0_i32_0 = arith.constant 0 : i32
    return %arg0, %c0_i32 : i32, i32
  }
  func.func @transform_5(%arg0: i32) -> (i32, i32, i32) {
    %c0_i32 = arith.constant 0 : i32
    %c0_i32_0 = arith.constant 0 : i32
    %c0_i32_1 = arith.constant 0 : i32
    return %arg0, %c0_i32, %c0_i32_0 : i32, i32, i32
  }
  func.func @transform_6(%arg0: i32) -> (i32, i32, i32) {
    %c0_i32 = arith.constant 0 : i32
    %c0_i32_0 = arith.constant 0 : i32
    %c0_i32_1 = arith.constant 0 : i32
    return %arg0, %c0_i32, %c0_i32_0 : i32, i32, i32
  }
}

</mosaic_0001>

<bundles_post_ra>
// kernel: tile.79
= control target key start
LH: loop header
LB: loop body
LE: loop exit
PB: predicated region body
PF: predicated region fallthrough
CT: control target
= control target key end

     0   :  { %vm6_vm0 = vcmask 1043458   ;;  %vm10_vm1 = vcmask 1045508   ;;  %vm14_vm2 = vcmask 1047558   ;;  %s24_s6 = smov 3  ;;  %s27_s7 = smov 12  ;;  %vm16_vm3 = vcmask 64512   ;;  %s974_s0 = inlined_call_operand.vmem [shape: f32[9,16,8], index: 0, kind: input, shape index: {}]   ;;  %s975_s1 = inlined_call_operand.vmem [shape: f32[9,128], index: 1, kind: output, shape index: {}]  }
   0x1   :  { %v460_v0 = vld [vmem:[%s974_s0 + $0xf] ss:$16 sm:%s24_s6]   ;;  %s32_s12 = smov 48  ;;  %s37_s13 = smov 192  ;;  %v470_v26 = vld [vmem:[%s974_s0 + $0x8e] sm:$0x1]  }
   0x2   :  { %v461_v1 = vld [vmem:[%s974_s0 + $0xf] ss:$16 sm:%s27_s7]   ;;  %s53_s18 = smov 3  ;;  %s56_s21 = smov 12  ;;  %v476_v32 = vld [vmem:[%s974_s0 + $0x8d] sm:$0x1]  }
   0x3   :  { %v30_v2 = vsel %vm6_vm0, %v461_v1, %v460_v0  ;;  %v462_v3 = vld [vmem:[%s974_s0 + $0xf] ss:$16 sm:%s32_s12]   ;;  %v466_v6 = vld [vmem:[%s974_s0 + $0xe] ss:$16 sm:%s53_s18]   ;;  %s61_s22 = smov 48  ;;  %s66_s27 = smov 192 }
   0x4   :  { %v463_v4 = vld [vmem:[%s974_s0 + $0xf] ss:$16 sm:%s37_s13]   ;;  %v35_v5 = vsel %vm10_vm1, %v462_v3, %v30_v2  ;;  %v467_v8 = vld [vmem:[%s974_s0 + $0xe] ss:$16 sm:%s56_s21]   ;;  %s565_s28 = smov 120   ;;  %s111_s2 = smov 3 }
   0x5   :  { %v40_v7 = vsel %vm14_vm2, %v463_v4, %v35_v5  ;;  %v468_v9 = vld [vmem:[%s974_s0 + $0xe] ss:$16 sm:%s61_s22]   ;;  %v59_v10 = vsel %vm6_vm0, %v467_v8, %v466_v6  ;;  %s114_s3 = smov 12  ;;  %v478_v14 = vld [vmem:[%s974_s0 + $0xc] ss:$16 sm:%s111_s2]   ;;  %s119_s6 = smov 48 }
   0x6   :  { %41 = vrot.lane.b32.xlu0 %v40_v7, %s565_s28  ;;  %v469_v11 = vld [vmem:[%s974_s0 + $0xe] ss:$16 sm:%s66_s27]   ;;  %v64_v12 = vsel %vm10_vm1, %v468_v9, %v59_v10  ;;  %s566_s7 = smov 112   ;;  %v464_v15 = vld [vmem:[%s974_s0 + $0x8f] sm:$0x1]   ;;  %s82_s12 = smov 3 }
   0x7   :  { %v69_v13 = vsel %vm14_vm2, %v469_v11, %v64_v12  ;;  %v479_v16 = vld [vmem:[%s974_s0 + $0xc] ss:$16 sm:%s114_s3]   ;;  %s85_s13 = smov 12  ;;  %v472_v17 = vld [vmem:[%s974_s0 + $0xd] ss:$16 sm:%s82_s12]   ;;  %s90_s18 = smov 48 }
   0x8   :  { %70 = vrot.lane.b32.xlu1 %v69_v13, %s566_s7  ;;  %v473_v18 = vld [vmem:[%s974_s0 + $0xd] ss:$16 sm:%s85_s13]   ;;  %s95_s19 = smov 192  ;;  %v117_v23 = vsel %vm6_vm0, %v479_v16, %v478_v14  ;;  %s124_s26 = smov 192  ;;  %v482_v37 = vld [vmem:[%s974_s0 + $0x8c] sm:$0x1]  }
   0x9   :  { %v88_v19 = vsel %vm6_vm0, %v473_v18, %v472_v17  ;;  %v474_v20 = vld [vmem:[%s974_s0 + $0xd] ss:$16 sm:%s90_s18]   ;;  %v480_v24 = vld [vmem:[%s974_s0 + $0xc] ss:$16 sm:%s119_s6]   ;;  %s567_s29 = smov 104   ;;  %s169_s3 = smov 3 }
   0xa   :  { %v475_v21 = vld [vmem:[%s974_s0 + $0xd] ss:$16 sm:%s95_s19]   ;;  %v93_v22 = vsel %vm10_vm1, %v474_v20, %v88_v19  ;;  %v122_v27 = vsel %vm10_vm1, %v480_v24, %v117_v23  ;;  %v481_v28 = vld [vmem:[%s974_s0 + $0xc] ss:$16 sm:%s124_s26]   ;;  %s140_s4 = smov 3  ;;  %s143_s5 = smov 12 }
   0xb   :  { %v98_v25 = vsel %vm14_vm2, %v475_v21, %v93_v22  ;;  %s172_s6 = smov 12  ;;  %v484_v29 = vld [vmem:[%s974_s0 + $0xb] ss:$16 sm:%s140_s4]   ;;  %s148_s11 = smov 48  ;;  %v127_v31 = vsel %vm14_vm2, %v481_v28, %v122_v27  ;;  %v490_v33 = vld [vmem:[%s974_s0 + $0xa] ss:$16 sm:%s169_s3]  }
   0xc   :  { %99 = vrot.lane.b32.xlu2 %v98_v25, %s567_s29  ;;  %v485_v30 = vld [vmem:[%s974_s0 + $0xb] ss:$16 sm:%s143_s5]   ;;  %s177_s18 = smov 48  ;;  %s153_s21 = smov 192  ;;  %v494_v56 = vld [vmem:[%s974_s0 + $0x8a] sm:$0x1]  }
   0xd   :  { %v491_v34 = vld [vmem:[%s974_s0 + $0xa] ss:$16 sm:%s172_s6]   ;;  %v146_v35 = vsel %vm6_vm0, %v485_v30, %v484_v29  ;;  %v486_v36 = vld [vmem:[%s974_s0 + $0xb] ss:$16 sm:%s148_s11]   ;;  %s568_s22 = smov 96   ;;  %s198_s25 = smov 3 }
   0xe   :  { %47 = vrot.lane.b32.xlu0 %v464_v15, %s565_s28  ;;  %s201_s26 = smov 12  ;;  %v175_v38 = vsel %vm6_vm0, %v491_v34, %v490_v33  ;;  %v492_v39 = vld [vmem:[%s974_s0 + $0xa] ss:$16 sm:%s177_s18]   ;;  %v151_v40 = vsel %vm10_vm1, %v486_v36, %v146_v35  ;;  %v488_v44 = vld [vmem:[%s974_s0 + $0x8b] sm:$0x1]   ;;  %s211_s14 = smov 192 }
   0xf   :  { %v487_v41 = vld [vmem:[%s974_s0 + $0xb] ss:$16 sm:%s153_s21]   ;;  %v496_v42 = vld [vmem:[%s974_s0 + $0x9] ss:$16 sm:%s198_s25]   ;;  %v180_v45 = vsel %vm10_vm1, %v492_v39, %v175_v38  ;;  %s569_s15 = smov 88   ;;  %s227_s16 = smov 3 }
  0x10   :  { %76 = vrot.lane.b32.xlu1 %v470_v26, %s566_s7  ;;  %v497_v43 = vld [vmem:[%s974_s0 + $0x9] ss:$16 sm:%s201_s26]   ;;  %s206_s7 = smov 48  ;;  %v156_v47 = vsel %vm14_vm2, %v487_v41, %v151_v40  ;;  %s230_s17 = smov 12  ;;  %v506_v4 = vld [vmem:[%s974_s0 + $0x88] sm:$0x1]  }
  0x11   :  { %v204_v48 = vsel %vm6_vm0, %v497_v43, %v496_v42  ;;  %v498_v49 = vld [vmem:[%s974_s0 + $0x9] ss:$16 sm:%s206_s7]   ;;  %s570_s20 = smov 80   ;;  %s256_s21 = smov 3  ;;  %v502_v53 = vld [vmem:[%s974_s0 + $0x8] ss:$16 sm:%s227_s16]  }
  0x12   :  { %v209_v51 = vsel %vm10_vm1, %v498_v49, %v204_v48  ;;  %v499_v52 = vld [vmem:[%s974_s0 + $0x9] ss:$16 sm:%s211_s14]   ;;  %v503_v54 = vld [vmem:[%s974_s0 + $0x8] ss:$16 sm:%s230_s17]   ;;  %s235_s27 = smov 48  ;;  %s264_s5 = smov 48 }
  0x13   :  { %v214_v55 = vsel %vm14_vm2, %v499_v52, %v209_v51  ;;  %v508_v57 = vld [vmem:[%s974_s0 + $0x7] ss:$16 sm:%s256_s21]   ;;  %v233_v59 = vsel %vm6_vm0, %v503_v54, %v502_v53  ;;  %v504_v60 = vld [vmem:[%s974_s0 + $0x8] ss:$16 sm:%s235_s27]   ;;  %s240_s8 = smov 192  ;;  %s571_s9 = smov 72  }
  0x14   :  { %105 = vrot.lane.b32.xlu2 %v476_v32, %s567_s29  ;;  %s182_s29 = smov 192  ;;  %v500_v61 = vld [vmem:[%s974_s0 + $0x89] sm:$0x1]   ;;  %s285_s12 = smov 3  ;;  %v510_v63 = vld [vmem:[%s974_s0 + $0x7] ss:$16 sm:%s264_s5]   ;;  %v238_v0 = vsel %vm10_vm1, %v504_v60, %v233_v59 }
  0x15   :  { %v493_v46 = vld [vmem:[%s974_s0 + $0xa] ss:$16 sm:%s182_s29]   ;;  %s288_s13 = smov 12  ;;  %s269_s16 = smov 192  ;;  %v505_v1 = vld [vmem:[%s974_s0 + $0x8] ss:$16 sm:%s240_s8]  }
  0x16   :  { %128 = vrot.lane.b32.xlu0 %v127_v31, %s568_s22  ;;  %v185_v50 = vsel %vm14_vm2, %v493_v46, %v180_v45  ;;  %v514_v2 = vld [vmem:[%s974_s0 + $0x6] ss:$16 sm:%s285_s12]   ;;  %s293_s23 = smov 48  ;;  %v243_v7 = vsel %vm14_vm2, %v505_v1, %v238_v0  ;;  %s298_s30 = smov 192  ;;  %v512_v16 = vld [vmem:[%s974_s0 + $0x87] sm:$0x1]  }
  0x17   :  { %v515_v3 = vld [vmem:[%s974_s0 + $0x6] ss:$16 sm:%s288_s13]   ;;  %v511_v6 = vld [vmem:[%s974_s0 + $0x7] ss:$16 sm:%s269_s16]   ;;  %s572_s2 = smov 64   ;;  %s314_s3 = smov 3 }
  0x18   :  { %134 = vrot.lane.b32.xlu1 %v482_v37, %s568_s22  ;;  %s259_s22 = smov 12  ;;  %v291_v8 = vsel %vm6_vm0, %v515_v3, %v514_v2  ;;  %v516_v9 = vld [vmem:[%s974_s0 + $0x6] ss:$16 sm:%s293_s23]   ;;  %s317_s4 = smov 12  ;;  %v524_v28 = vld [vmem:[%s974_s0 + $0x85] sm:$0x1]  }
  0x19   :  { %v509_v58 = vld [vmem:[%s974_s0 + $0x7] ss:$16 sm:%s259_s22]   ;;  %v296_v11 = vsel %vm10_vm1, %v516_v9, %v291_v8  ;;  %v517_v12 = vld [vmem:[%s974_s0 + $0x6] ss:$16 sm:%s298_s30]   ;;  %s573_s7 = smov 56   ;;  %s343_s8 = smov 3 }
  0x1a   :  { %v262_v62 = vsel %vm6_vm0, %v509_v58, %v508_v57  ;;  %v520_v13 = vld [vmem:[%s974_s0 + $0x5] ss:$16 sm:%s314_s3]   ;;  %s322_s14 = smov 48  ;;  %v301_v15 = vsel %vm14_vm2, %v517_v12, %v296_v11  ;;  %v526_v17 = vld [vmem:[%s974_s0 + $0x4] ss:$16 sm:%s343_s8]   ;;  %s351_s21 = smov 48 }
  0x1b   :  { %v267_v5 = vsel %vm10_vm1, %v510_v63, %v262_v62  ;;  %v521_v14 = vld [vmem:[%s974_s0 + $0x5] ss:$16 sm:%s317_s4]   ;;  %s327_s24 = smov 192  ;;  %s574_s25 = smov 48   ;;  %v518_v21 = vld [vmem:[%s974_s0 + $0x86] sm:$0x1]  }
  0x1c   :  { %157 = vrot.lane.b32.xlu2 %v156_v47, %s569_s15  ;;  %v272_v10 = vsel %vm14_vm2, %v511_v6, %v267_v5  ;;  %v320_v19 = vsel %vm6_vm0, %v521_v14, %v520_v13  ;;  %v522_v20 = vld [vmem:[%s974_s0 + $0x5] ss:$16 sm:%s322_s14]   ;;  %s372_s28 = smov 3  ;;  %s375_s29 = smov 12  ;;  %v530_v40 = vld [vmem:[%s974_s0 + $0x84] sm:$0x1]  }
  0x1d   :  { %v528_v23 = vld [vmem:[%s974_s0 + $0x4] ss:$16 sm:%s351_s21]   ;;  %s356_s3 = smov 192  ;;  %v325_v24 = vsel %vm10_vm1, %v522_v20, %v320_v19  ;;  %v523_v25 = vld [vmem:[%s974_s0 + $0x5] ss:$16 sm:%s327_s24]   ;;  %s380_s10 = smov 48 }
  0x1e   :  { %163 = vrot.lane.b32.xlu0 %v488_v44, %s569_s15  ;;  %v532_v26 = vld [vmem:[%s974_s0 + $0x3] ss:$16 sm:%s372_s28]   ;;  %v330_v31 = vsel %vm14_vm2, %v523_v25, %v325_v24  ;;  %s385_s17 = smov 192  ;;  %s575_s18 = smov 40   ;;  %v458_v63 = vld [vmem:[%s974_s0 + $0x80] sm:$0x1]  }
  0x1f   :  { %v533_v27 = vld [vmem:[%s974_s0 + $0x3] ss:$16 sm:%s375_s29]   ;;  %v529_v30 = vld [vmem:[%s974_s0 + $0x4] ss:$16 sm:%s356_s3]   ;;  %s401_s19 = smov 3  ;;  %s576_s23 = smov 32  }
  0x20   :  { %186 = vrot.lane.b32.xlu1 %v185_v50, %s570_s20  ;;  %v378_v32 = vsel %vm6_vm0, %v533_v27, %v532_v26  ;;  %v534_v33 = vld [vmem:[%s974_s0 + $0x3] ss:$16 sm:%s380_s10]   ;;  %s430_s24 = smov 3  ;;  %s409_s30 = smov 48  ;;  %v542_v50 = vld [vmem:[%s974_s0 + $0x82] sm:$0x1]  }
  0x21   :  { %v383_v35 = vsel %vm10_vm1, %v534_v33, %v378_v32  ;;  %v535_v36 = vld [vmem:[%s974_s0 + $0x3] ss:$16 sm:%s385_s17]   ;;  %v538_v37 = vld [vmem:[%s974_s0 + $0x2] ss:$16 sm:%s401_s19]   ;;  %s438_s8 = smov 48  ;;  %s414_s11 = smov 192 }
  0x22   :  { %v388_v39 = vsel %vm14_vm2, %v535_v36, %v383_v35  ;;  %v544_v41 = vld [vmem:[%s974_s0 + $0x1] ss:$16 sm:%s430_s24]   ;;  %v540_v44 = vld [vmem:[%s974_s0 + $0x2] ss:$16 sm:%s409_s30]   ;;  %s577_s12 = smov 24   ;;  %s443_s17 = smov 192 }
  0x23   :  { %v536_v45 = vld [vmem:[%s974_s0 + $0x83] sm:$0x1]   ;;  %v546_v47 = vld [vmem:[%s974_s0 + $0x1] ss:$16 sm:%s438_s8]   ;;  %s578_s24 = smov 16   ;;  %s2_s28 = smov 3 }
  0x24   :  { %192 = vrot.lane.b32.xlu2 %v494_v56, %s570_s20  ;;  %s404_s20 = smov 12  ;;  %v541_v49 = vld [vmem:[%s974_s0 + $0x2] ss:$16 sm:%s414_s11]   ;;  %s4_s29 = smov 12  ;;  %459 = vst.msk [vmem:[%s975_s1 + $0x8] sm:$0x1] %vm16_vm3, %v458_v63  }
  0x25   :  { %v539_v38 = vld [vmem:[%s974_s0 + $0x2] ss:$16 sm:%s404_s20]   ;;  %v547_v52 = vld [vmem:[%s974_s0 + $0x1] ss:$16 sm:%s443_s17]   ;;  %s8_s30 = smov 48  ;;  %vm43_vm4 = vcmask 1048512  }
  0x26   :  { %215 = vrot.lane.b32.xlu0 %v214_v55, %s571_s9  ;;  %v407_v43 = vsel %vm6_vm0, %v539_v38, %v538_v37  ;;  %v548_v55 = vld [vmem:[%s974_s0 + $0x81] sm:$0x1]   ;;  %v3_v56 = vld [vmem:[%s974_s0] ss:$16 sm:%s2_s28]   ;;  %vm72_vm5 = vcmask 982912   ;;  %vm101_vm6 = vcmask 917312  }
  0x27   :  { %v412_v48 = vsel %vm10_vm1, %v540_v44, %v407_v43  ;;  %v5_v57 = vld [vmem:[%s974_s0] ss:$16 sm:%s4_s29]   ;;  %vm130_vm7 = vcmask 851712   ;;  %vm159_vm8 = vcmask 786112   ;;  %vm188_vm9 = vcmask 720512  }
  0x28   :  { %221 = vrot.lane.b32.xlu1 %v500_v61, %s571_s9  ;;  %s346_s9 = smov 12  ;;  %v417_v53 = vsel %vm14_vm2, %v541_v49, %v412_v48  ;;  %v9_v58 = vld [vmem:[%s974_s0] ss:$16 sm:%s8_s30]   ;;  %v7_v59 = vsel %vm6_vm0, %v5_v57, %v3_v56  ;;  %vm217_vm10 = vcmask 654912   ;;  %vm246_vm11 = vcmask 589312  }
  0x29   :  { %v527_v18 = vld [vmem:[%s974_s0 + $0x4] ss:$16 sm:%s346_s9]   ;;  %v11_v61 = vsel %vm10_vm1, %v9_v58, %v7_v59  ;;  %vm275_vm12 = vcmask 523712   ;;  %vm304_vm13 = vcmask 458112   ;;  %vm333_vm14 = vcmask 392512  }
  0x2a   :  { %v349_v22 = vsel %vm6_vm0, %v527_v18, %v526_v17  ;;  %vm362_vm15 = vcmask 326912  }
  0x2b   :  { %v354_v29 = vsel %vm10_vm1, %v528_v23, %v349_v22 }
  0x2c   :  { %244 = vrot.lane.b32.xlu2 %v243_v7, %s572_s2  ;;  %v359_v34 = vsel %vm14_vm2, %v529_v30, %v354_v29 }
  0x2e   :  { %250 = vrot.lane.b32.xlu0 %v506_v4, %s572_s2  ;;  %s12_s2 = smov 192 }
  0x2f   :  { %v13_v60 = vld [vmem:[%s974_s0] ss:$16 sm:%s12_s2]  }
  0x30   :  { %273 = vrot.lane.b32.xlu1 %v272_v10, %s573_s7  ;;  %v15_v62 = vsel %vm14_vm2, %v13_v60, %v11_v61 }
  0x31   :  { %17 = vst.msk [vmem:[%s975_s1] sm:$0xff] %vm16_vm3, %v15_v62  }
  0x34   :  { %279 = vrot.lane.b32.xlu2 %v512_v16, %s573_s7 }
  0x36   :  { %302 = vrot.lane.b32.xlu0 %v301_v15, %s574_s25 }
  0x38   :  { %308 = vrot.lane.b32.xlu1 %v518_v21, %s574_s25  ;;  %s433_s25 = smov 12 }
  0x39   :  { %v545_v42 = vld [vmem:[%s974_s0 + $0x1] ss:$16 sm:%s433_s25]   ;;  %s579_s25 = smov 8  }
  0x3a   :  { %v436_v46 = vsel %vm6_vm0, %v545_v42, %v544_v41  ;;  %vm391_vm0 = vcmask 261312  }
  0x3b   :  { %v441_v51 = vsel %vm10_vm1, %v546_v47, %v436_v46  ;;  %vm420_vm1 = vcmask 195712  }
  0x3c   :  { %331 = vrot.lane.b32.xlu2 %v330_v31, %s575_s18  ;;  %v446_v54 = vsel %vm14_vm2, %v547_v52, %v441_v51  ;;  %vm449_vm2 = vcmask 130112  }
  0x3e   :  { %337 = vrot.lane.b32.xlu0 %v524_v28, %s575_s18 }
  0x40   :  { %360 = vrot.lane.b32.xlu1 %v359_v34, %s576_s23 }
  0x44   :  { %366 = vrot.lane.b32.xlu2 %v530_v40, %s576_s23 }
  0x46   :  { %389 = vrot.lane.b32.xlu0 %v388_v39, %s577_s12 }
  0x48   :  { %395 = vrot.lane.b32.xlu1 %v536_v45, %s577_s12 }
  0x4c   :  { %418 = vrot.lane.b32.xlu2 %v417_v53, %s578_s24 }
  0x4e   :  { %424 = vrot.lane.b32.xlu0 %v542_v50, %s578_s24 }
  0x50   :  { %447 = vrot.lane.b32.xlu1 %v446_v54, %s579_s25 }
  0x54   :  { %453 = vrot.lane.b32.xlu2 %v548_v55, %s579_s25 }
  0x66   :  { %v100_v0 = vpop.permute.xlu2 %99  }
  0x6e   :  { %v106_v1 = vpop.permute.xlu2 %105  }
  0x76   :  { %v158_v3 = vpop.permute.xlu2 %157  }
  0x78   :  { %v42_v2 = vpop.permute.xlu0 %41  }
  0x79   :  { %44 = vst.msk [vmem:[%s975_s1] sm:$0xff] %vm43_vm4, %v42_v2  }
  0x7a   :  { %v71_v4 = vpop.permute.xlu1 %70  }
  0x7b   :  { %73 = vst.msk [vmem:[%s975_s1] sm:$0xff] %vm72_vm5, %v71_v4  }
  0x7c   :  { %102 = vst.msk [vmem:[%s975_s1] sm:$0xff] %vm101_vm6, %v100_v0  }
  0x7e   :  { %v193_v6 = vpop.permute.xlu2 %192  }
  0x80   :  { %v48_v5 = vpop.permute.xlu0 %47  }
  0x81   :  { %465 = vst.msk [vmem:[%s975_s1 + $0x8] sm:$0x1] %vm43_vm4, %v48_v5  }
  0x82   :  { %v77_v7 = vpop.permute.xlu1 %76  }
  0x83   :  { %471 = vst.msk [vmem:[%s975_s1 + $0x8] sm:$0x1] %vm72_vm5, %v77_v7  }
  0x84   :  { %477 = vst.msk [vmem:[%s975_s1 + $0x8] sm:$0x1] %vm101_vm6, %v106_v1  }
  0x86   :  { %v245_v9 = vpop.permute.xlu2 %244  }
  0x88   :  { %v129_v8 = vpop.permute.xlu0 %128  }
  0x89   :  { %131 = vst.msk [vmem:[%s975_s1] sm:$0xff] %vm130_vm7, %v129_v8  }
  0x8a   :  { %160 = vst.msk [vmem:[%s975_s1] sm:$0xff] %vm159_vm8, %v158_v3   ;;  %v135_v10 = vpop.permute.xlu1 %134  }
  0x8b   :  { %483 = vst.msk [vmem:[%s975_s1 + $0x8] sm:$0x1] %vm130_vm7, %v135_v10  }
  0x8e   :  { %v280_v12 = vpop.permute.xlu2 %279  }
  0x90   :  { %v164_v11 = vpop.permute.xlu0 %163  }
  0x91   :  { %489 = vst.msk [vmem:[%s975_s1 + $0x8] sm:$0x1] %vm159_vm8, %v164_v11  }
  0x92   :  { %495 = vst.msk [vmem:[%s975_s1 + $0x8] sm:$0x1] %vm188_vm9, %v193_v6   ;;  %v187_v13 = vpop.permute.xlu1 %186  }
  0x93   :  { %189 = vst.msk [vmem:[%s975_s1] sm:$0xff] %vm188_vm9, %v187_v13  }
  0x96   :  { %v332_v15 = vpop.permute.xlu2 %331  }
  0x98   :  { %v216_v14 = vpop.permute.xlu0 %215  }
  0x99   :  { %218 = vst.msk [vmem:[%s975_s1] sm:$0xff] %vm217_vm10, %v216_v14  }
  0x9a   :  { %247 = vst.msk [vmem:[%s975_s1] sm:$0xff] %vm246_vm11, %v245_v9   ;;  %v222_v16 = vpop.permute.xlu1 %221  }
  0x9b   :  { %501 = vst.msk [vmem:[%s975_s1 + $0x8] sm:$0x1] %vm217_vm10, %v222_v16  }
  0x9e   :  { %v367_v18 = vpop.permute.xlu2 %366  }
  0xa0   :  { %v251_v17 = vpop.permute.xlu0 %250  }
  0xa1   :  { %507 = vst.msk [vmem:[%s975_s1 + $0x8] sm:$0x1] %vm246_vm11, %v251_v17  }
  0xa2   :  { %513 = vst.msk [vmem:[%s975_s1 + $0x8] sm:$0x1] %vm275_vm12, %v280_v12   ;;  %v274_v19 = vpop.permute.xlu1 %273  }
  0xa3   :  { %276 = vst.msk [vmem:[%s975_s1] sm:$0xff] %vm275_vm12, %v274_v19  }
  0xa6   :  { %v419_v21 = vpop.permute.xlu2 %418  }
  0xa8   :  { %v303_v20 = vpop.permute.xlu0 %302  }
  0xa9   :  { %305 = vst.msk [vmem:[%s975_s1] sm:$0xff] %vm304_vm13, %v303_v20  }
  0xaa   :  { %334 = vst.msk [vmem:[%s975_s1] sm:$0xff] %vm333_vm14, %v332_v15   ;;  %v309_v22 = vpop.permute.xlu1 %308  }
  0xab   :  { %519 = vst.msk [vmem:[%s975_s1 + $0x8] sm:$0x1] %vm304_vm13, %v309_v22  }
  0xae   :  { %v454_v24 = vpop.permute.xlu2 %453  }
  0xb0   :  { %v338_v23 = vpop.permute.xlu0 %337  }
  0xb1   :  { %525 = vst.msk [vmem:[%s975_s1 + $0x8] sm:$0x1] %vm333_vm14, %v338_v23  }
  0xb2   :  { %531 = vst.msk [vmem:[%s975_s1 + $0x8] sm:$0x1] %vm362_vm15, %v367_v18   ;;  %v361_v25 = vpop.permute.xlu1 %360  }
  0xb3   :  { %363 = vst.msk [vmem:[%s975_s1] sm:$0xff] %vm362_vm15, %v361_v25  }
  0xb8   :  { %v390_v26 = vpop.permute.xlu0 %389  }
  0xb9   :  { %392 = vst.msk [vmem:[%s975_s1] sm:$0xff] %vm391_vm0, %v390_v26  }
  0xba   :  { %421 = vst.msk [vmem:[%s975_s1] sm:$0xff] %vm420_vm1, %v419_v21   ;;  %v396_v27 = vpop.permute.xlu1 %395  }
  0xbb   :  { %537 = vst.msk [vmem:[%s975_s1 + $0x8] sm:$0x1] %vm391_vm0, %v396_v27  }
  0xc0   :  { %v425_v28 = vpop.permute.xlu0 %424  }
  0xc1   :  { %543 = vst.msk [vmem:[%s975_s1 + $0x8] sm:$0x1] %vm420_vm1, %v425_v28  }
  0xc2   :  { %549 = vst.msk [vmem:[%s975_s1 + $0x8] sm:$0x1] %vm449_vm2, %v454_v24   ;;  %v448_v29 = vpop.permute.xlu1 %447  }
  0xc3   :  { %450 = vst.msk [vmem:[%s975_s1] sm:$0xff] %vm449_vm2, %v448_v29  }

// kernel: tile.63
= control target key start
LH: loop header
LB: loop body
LE: loop exit
PB: predicated region body
PF: predicated region fallthrough
CT: control target
= control target key end

     0   :  { %s28_s0 = inlined_call_operand.vmem [shape: f32[4], index: 0, kind: input, shape index: {}]   ;;  %s29_s1 = inlined_call_operand.vmem [shape: f32[16,4], index: 1, kind: output, shape index: {}]  }
   0x1   :  { %v4_v0 = vld [vmem:[%s28_s0] ss:$0 sm:$0xff] }
   0x2   :  { %5 = vst [vmem:[%s29_s1] sm:$0xff] %v4_v0 }
   0x3   :  { %8 = vst [vmem:[%s29_s1 + $0x8] sm:$0xff] %v4_v0 }

// kernel: tile.64
= control target key start
LH: loop header
LB: loop body
LE: loop exit
PB: predicated region body
PF: predicated region fallthrough
CT: control target
= control target key end

     0   :  { %s131_s10 = smov 60   ;;  %s132_s11 = smov 52   ;;  %vm3_vm0 = vcmask 31744   ;;  %vm9_vm1 = vcmask 523744   ;;  %vm15_vm2 = vcmask 490944   ;;  %vm21_vm3 = vcmask 458144   ;;  %s207_s0 = inlined_call_operand.vmem [shape: f32[16,4], index: 0, kind: input, shape index: {}]   ;;  %s208_s1 = inlined_call_operand.vmem [shape: f32[1,64], index: 1, kind: output, shape index: {}]  }
   0x1   :  { %v101_v0 = vld [vmem:[%s207_s0 + $0xf] sm:$0x1]   ;;  %v103_v1 = vld [vmem:[%s207_s0 + $0xd] sm:$0x1]   ;;  %v105_v2 = vld [vmem:[%s207_s0 + $0xb] sm:$0x1]  }
   0x2   :  { %7 = vrot.lane.b32.xlu0 %v101_v0, %s131_s10  ;;  %19 = vrot.lane.b32.xlu1 %v103_v1, %s132_s11  ;;  %s133_s14 = smov 44   ;;  %v102_v3 = vld [vmem:[%s207_s0 + $0xe] sm:$0x1]   ;;  %v104_v4 = vld [vmem:[%s207_s0 + $0xc] sm:$0x1]   ;;  %s134_s19 = smov 56  }
   0x3   :  { %31 = vrot.lane.b32.xlu2 %v105_v2, %s133_s14  ;;  %s135_s20 = smov 48   ;;  %v106_v5 = vld [vmem:[%s207_s0 + $0xa] sm:$0x1]   ;;  %s136_s23 = smov 40   ;;  %v107_v6 = vld [vmem:[%s207_s0 + $0x9] sm:$0x1]  }
   0x4   :  { %v108_v7 = vld [vmem:[%s207_s0 + $0x8] sm:$0x1]   ;;  %s137_s28 = smov 36   ;;  %s138_s29 = smov 32   ;;  %v109_v8 = vld [vmem:[%s207_s0 + $0x7] sm:$0x1]  }
   0x5   :  { %s139_s3 = smov 28   ;;  %v110_v9 = vld [vmem:[%s207_s0 + $0x6] sm:$0x1]   ;;  %v111_v10 = vld [vmem:[%s207_s0 + $0x5] sm:$0x1]   ;;  %s140_s8 = smov 24  }
   0x6   :  { %s141_s9 = smov 20   ;;  %v112_v11 = vld [vmem:[%s207_s0 + $0x4] sm:$0x1]   ;;  %s142_s12 = smov 16   ;;  %v113_v12 = vld [vmem:[%s207_s0 + $0x3] sm:$0x1]  }
   0x7   :  { %v114_v13 = vld [vmem:[%s207_s0 + $0x2] sm:$0x1]   ;;  %s143_s17 = smov 12   ;;  %s144_s18 = smov 8   ;;  %v115_v14 = vld [vmem:[%s207_s0 + $0x1] sm:$0x1]  }
   0x8   :  { %s145_s21 = smov 4   ;;  %v2_v15 = vld [vmem:[%s207_s0] sm:$0x1]   ;;  %vm27_vm4 = vcmask 425344   ;;  %vm33_vm5 = vcmask 392544   ;;  %vm39_vm6 = vcmask 359744  }
   0x9   :  { %4 = vst.msk [vmem:[#allocation0] sm:$0x1] %vm3_vm0, %v2_v15   ;;  %vm45_vm7 = vcmask 326944   ;;  %vm51_vm8 = vcmask 294144   ;;  %vm57_vm9 = vcmask 261344   ;;  %vm63_vm10 = vcmask 228544  }
   0xa   :  { %13 = vrot.lane.b32.xlu0 %v102_v3, %s134_s19  ;;  %25 = vrot.lane.b32.xlu1 %v104_v4, %s135_s20  ;;  %vm69_vm11 = vcmask 195744   ;;  %vm75_vm12 = vcmask 162944   ;;  %vm81_vm13 = vcmask 130144   ;;  %vm87_vm14 = vcmask 97344  }
   0xb   :  { %37 = vrot.lane.b32.xlu2 %v106_v5, %s136_s23  ;;  %vm93_vm15 = vcmask 64544  }
  0x12   :  { %43 = vrot.lane.b32.xlu0 %v107_v6, %s137_s28  ;;  %49 = vrot.lane.b32.xlu1 %v108_v7, %s138_s29 }
  0x13   :  { %55 = vrot.lane.b32.xlu2 %v109_v8, %s139_s3 }
  0x1a   :  { %61 = vrot.lane.b32.xlu0 %v110_v9, %s140_s8  ;;  %67 = vrot.lane.b32.xlu1 %v111_v10, %s141_s9 }
  0x1b   :  { %73 = vrot.lane.b32.xlu2 %v112_v11, %s142_s12 }
  0x22   :  { %79 = vrot.lane.b32.xlu0 %v113_v12, %s143_s17  ;;  %85 = vrot.lane.b32.xlu1 %v114_v13, %s144_s18 }
  0x23   :  { %91 = vrot.lane.b32.xlu2 %v115_v14, %s145_s21 }
  0x5d   :  { %v32_v16 = vpop.permute.xlu2 %31  }
  0x65   :  { %v38_v17 = vpop.permute.xlu2 %37  }
  0x6d   :  { %v56_v18 = vpop.permute.xlu2 %55  }
  0x74   :  { %v8_v19 = vpop.permute.xlu0 %7   ;;  %v20_v20 = vpop.permute.xlu1 %19  }
  0x75   :  { %10 = vst.msk [vmem:[#allocation0] sm:$0x1] %vm9_vm1, %v8_v19   ;;  %v74_v21 = vpop.permute.xlu2 %73  }
  0x7c   :  { %v14_v22 = vpop.permute.xlu0 %13   ;;  %v26_v23 = vpop.permute.xlu1 %25  }
  0x7d   :  { %16 = vst.msk [vmem:[#allocation0] sm:$0x1] %vm15_vm2, %v14_v22   ;;  %v92_v24 = vpop.permute.xlu2 %91  }
  0x7e   :  { %22 = vst.msk [vmem:[#allocation0] sm:$0x1] %vm21_vm3, %v20_v20  }
  0x7f   :  { %28 = vst.msk [vmem:[#allocation0] sm:$0x1] %vm27_vm4, %v26_v23  }
  0x80   :  { %34 = vst.msk [vmem:[#allocation0] sm:$0x1] %vm33_vm5, %v32_v16  }
  0x81   :  { %40 = vst.msk [vmem:[#allocation0] sm:$0x1] %vm39_vm6, %v38_v17  }
  0x84   :  { %v44_v25 = vpop.permute.xlu0 %43   ;;  %v50_v26 = vpop.permute.xlu1 %49  }
  0x85   :  { %46 = vst.msk [vmem:[#allocation0] sm:$0x1] %vm45_vm7, %v44_v25  }
  0x86   :  { %52 = vst.msk [vmem:[#allocation0] sm:$0x1] %vm51_vm8, %v50_v26  }
  0x87   :  { %58 = vst.msk [vmem:[#allocation0] sm:$0x1] %vm57_vm9, %v56_v18  }
  0x8c   :  { %v62_v27 = vpop.permute.xlu0 %61   ;;  %v68_v28 = vpop.permute.xlu1 %67  }
  0x8d   :  { %64 = vst.msk [vmem:[#allocation0] sm:$0x1] %vm63_vm10, %v62_v27  }
  0x8e   :  { %70 = vst.msk [vmem:[#allocation0] sm:$0x1] %vm69_vm11, %v68_v28  }
  0x8f   :  { %76 = vst.msk [vmem:[#allocation0] sm:$0x1] %vm75_vm12, %v74_v21  }
  0x94   :  { %v80_v29 = vpop.permute.xlu0 %79   ;;  %v86_v30 = vpop.permute.xlu1 %85  }
  0x95   :  { %82 = vst.msk [vmem:[#allocation0] sm:$0x1] %vm81_vm13, %v80_v29  }
  0x96   :  { %88 = vst.msk [vmem:[#allocation0] sm:$0x1] %vm87_vm14, %v86_v30  }
  0x97   :  { %94 = vst.msk [vmem:[#allocation0] sm:$0x1] %vm93_vm15, %v92_v24  }
  0x9e   :  { %v97_v31 = vld [vmem:[#allocation0] sm:$0x1] }
  0x9f   :  { %100 = vst [vmem:[%s208_s1] sm:$0x1] %v97_v31 }

// kernel: tile.73
= control target key start
LH: loop header
LB: loop body
LE: loop exit
PB: predicated region body
PF: predicated region fallthrough
CT: control target
= control target key end

     0   :  { %s28_s0 = inlined_call_operand.vmem [shape: f32[8], index: 0, kind: input, shape index: {}]   ;;  %s29_s1 = inlined_call_operand.vmem [shape: f32[16,8], index: 1, kind: output, shape index: {}]  }
   0x1   :  { %v4_v0 = vld [vmem:[%s28_s0] ss:$0 sm:$0xff] }
   0x2   :  { %5 = vst [vmem:[%s29_s1] sm:$0xff] %v4_v0 }
   0x3   :  { %8 = vst [vmem:[%s29_s1 + $0x8] sm:$0xff] %v4_v0 }

// kernel: tile.74
= control target key start
LH: loop header
LB: loop body
LE: loop exit
PB: predicated region body
PF: predicated region fallthrough
CT: control target
= control target key end

     0   :  { %s131_s10 = smov 120   ;;  %s132_s11 = smov 104   ;;  %vm3_vm0 = vcmask 64512   ;;  %vm9_vm1 = vcmask 1048512   ;;  %vm15_vm2 = vcmask 982912   ;;  %vm21_vm3 = vcmask 917312   ;;  %s207_s0 = inlined_call_operand.vmem [shape: f32[16,8], index: 0, kind: input, shape index: {}]   ;;  %s208_s1 = inlined_call_operand.vmem [shape: f32[1,128], index: 1, kind: output, shape index: {}]  }
   0x1   :  { %v101_v0 = vld [vmem:[%s207_s0 + $0xf] sm:$0x1]   ;;  %v103_v1 = vld [vmem:[%s207_s0 + $0xd] sm:$0x1]   ;;  %v105_v2 = vld [vmem:[%s207_s0 + $0xb] sm:$0x1]  }
   0x2   :  { %7 = vrot.lane.b32.xlu0 %v101_v0, %s131_s10  ;;  %19 = vrot.lane.b32.xlu1 %v103_v1, %s132_s11  ;;  %s133_s14 = smov 88   ;;  %v102_v3 = vld [vmem:[%s207_s0 + $0xe] sm:$0x1]   ;;  %v104_v4 = vld [vmem:[%s207_s0 + $0xc] sm:$0x1]   ;;  %s134_s19 = smov 112  }
   0x3   :  { %31 = vrot.lane.b32.xlu2 %v105_v2, %s133_s14  ;;  %s135_s20 = smov 96   ;;  %v106_v5 = vld [vmem:[%s207_s0 + $0xa] sm:$0x1]   ;;  %s136_s23 = smov 80   ;;  %v107_v6 = vld [vmem:[%s207_s0 + $0x9] sm:$0x1]  }
   0x4   :  { %v108_v7 = vld [vmem:[%s207_s0 + $0x8] sm:$0x1]   ;;  %s137_s28 = smov 72   ;;  %s138_s29 = smov 64   ;;  %v109_v8 = vld [vmem:[%s207_s0 + $0x7] sm:$0x1]  }
   0x5   :  { %s139_s3 = smov 56   ;;  %v110_v9 = vld [vmem:[%s207_s0 + $0x6] sm:$0x1]   ;;  %v111_v10 = vld [vmem:[%s207_s0 + $0x5] sm:$0x1]   ;;  %s140_s8 = smov 48  }
   0x6   :  { %s141_s9 = smov 40   ;;  %v112_v11 = vld [vmem:[%s207_s0 + $0x4] sm:$0x1]   ;;  %s142_s12 = smov 32   ;;  %v113_v12 = vld [vmem:[%s207_s0 + $0x3] sm:$0x1]  }
   0x7   :  { %v114_v13 = vld [vmem:[%s207_s0 + $0x2] sm:$0x1]   ;;  %s143_s17 = smov 24   ;;  %s144_s18 = smov 16   ;;  %v115_v14 = vld [vmem:[%s207_s0 + $0x1] sm:$0x1]  }
   0x8   :  { %s145_s21 = smov 8   ;;  %v2_v15 = vld [vmem:[%s207_s0] sm:$0x1]   ;;  %vm27_vm4 = vcmask 851712   ;;  %vm33_vm5 = vcmask 786112   ;;  %vm39_vm6 = vcmask 720512  }
   0x9   :  { %4 = vst.msk [vmem:[#allocation0] sm:$0x1] %vm3_vm0, %v2_v15   ;;  %vm45_vm7 = vcmask 654912   ;;  %vm51_vm8 = vcmask 589312   ;;  %vm57_vm9 = vcmask 523712   ;;  %vm63_vm10 = vcmask 458112  }
   0xa   :  { %13 = vrot.lane.b32.xlu0 %v102_v3, %s134_s19  ;;  %25 = vrot.lane.b32.xlu1 %v104_v4, %s135_s20  ;;  %vm69_vm11 = vcmask 392512   ;;  %vm75_vm12 = vcmask 326912   ;;  %vm81_vm13 = vcmask 261312   ;;  %vm87_vm14 = vcmask 195712  }
   0xb   :  { %37 = vrot.lane.b32.xlu2 %v106_v5, %s136_s23  ;;  %vm93_vm15 = vcmask 130112  }
  0x12   :  { %43 = vrot.lane.b32.xlu0 %v107_v6, %s137_s28  ;;  %49 = vrot.lane.b32.xlu1 %v108_v7, %s138_s29 }
  0x13   :  { %55 = vrot.lane.b32.xlu2 %v109_v8, %s139_s3 }
  0x1a   :  { %61 = vrot.lane.b32.xlu0 %v110_v9, %s140_s8  ;;  %67 = vrot.lane.b32.xlu1 %v111_v10, %s141_s9 }
  0x1b   :  { %73 = vrot.lane.b32.xlu2 %v112_v11, %s142_s12 }
  0x22   :  { %79 = vrot.lane.b32.xlu0 %v113_v12, %s143_s17  ;;  %85 = vrot.lane.b32.xlu1 %v114_v13, %s144_s18 }
  0x23   :  { %91 = vrot.lane.b32.xlu2 %v115_v14, %s145_s21 }
  0x5d   :  { %v32_v16 = vpop.permute.xlu2 %31  }
  0x65   :  { %v38_v17 = vpop.permute.xlu2 %37  }
  0x6d   :  { %v56_v18 = vpop.permute.xlu2 %55  }
  0x74   :  { %v8_v19 = vpop.permute.xlu0 %7   ;;  %v20_v20 = vpop.permute.xlu1 %19  }
  0x75   :  { %10 = vst.msk [vmem:[#allocation0] sm:$0x1] %vm9_vm1, %v8_v19   ;;  %v74_v21 = vpop.permute.xlu2 %73  }
  0x7c   :  { %v14_v22 = vpop.permute.xlu0 %13   ;;  %v26_v23 = vpop.permute.xlu1 %25  }
  0x7d   :  { %16 = vst.msk [vmem:[#allocation0] sm:$0x1] %vm15_vm2, %v14_v22   ;;  %v92_v24 = vpop.permute.xlu2 %91  }
  0x7e   :  { %22 = vst.msk [vmem:[#allocation0] sm:$0x1] %vm21_vm3, %v20_v20  }
  0x7f   :  { %28 = vst.msk [vmem:[#allocation0] sm:$0x1] %vm27_vm4, %v26_v23  }
  0x80   :  { %34 = vst.msk [vmem:[#allocation0] sm:$0x1] %vm33_vm5, %v32_v16  }
  0x81   :  { %40 = vst.msk [vmem:[#allocation0] sm:$0x1] %vm39_vm6, %v38_v17  }
  0x84   :  { %v44_v25 = vpop.permute.xlu0 %43   ;;  %v50_v26 = vpop.permute.xlu1 %49  }
  0x85   :  { %46 = vst.msk [vmem:[#allocation0] sm:$0x1] %vm45_vm7, %v44_v25  }
  0x86   :  { %52 = vst.msk [vmem:[#allocation0] sm:$0x1] %vm51_vm8, %v50_v26  }
  0x87   :  { %58 = vst.msk [vmem:[#allocation0] sm:$0x1] %vm57_vm9, %v56_v18  }
  0x8c   :  { %v62_v27 = vpop.permute.xlu0 %61   ;;  %v68_v28 = vpop.permute.xlu1 %67  }
  0x8d   :  { %64 = vst.msk [vmem:[#allocation0] sm:$0x1] %vm63_vm10, %v62_v27  }
  0x8e   :  { %70 = vst.msk [vmem:[#allocation0] sm:$0x1] %vm69_vm11, %v68_v28  }
  0x8f   :  { %76 = vst.msk [vmem:[#allocation0] sm:$0x1] %vm75_vm12, %v74_v21  }
  0x94   :  { %v80_v29 = vpop.permute.xlu0 %79   ;;  %v86_v30 = vpop.permute.xlu1 %85  }
  0x95   :  { %82 = vst.msk [vmem:[#allocation0] sm:$0x1] %vm81_vm13, %v80_v29  }
  0x96   :  { %88 = vst.msk [vmem:[#allocation0] sm:$0x1] %vm87_vm14, %v86_v30  }
  0x97   :  { %94 = vst.msk [vmem:[#allocation0] sm:$0x1] %vm93_vm15, %v92_v24  }
  0x9e   :  { %v97_v31 = vld [vmem:[#allocation0] sm:$0x1] }
  0x9f   :  { %100 = vst [vmem:[%s208_s1] sm:$0x1] %v97_v31 }

// kernel: halo_unet_block.5
= control target key start
LH: loop header
LB: loop body
LE: loop exit
PB: predicated region body
PF: predicated region fallthrough
CT: control target
= control target key end

     0   :  { %vm52_vm0 = vcmask 523264   ;;  %s259_s3 = inlined_call_operand.vmem [shape: f32[64,128], index: 3, kind: input, shape index: {}]   ;;  %s260_s0 = inlined_call_operand.vmem [shape: f32[32,64], index: 0, kind: input, shape index: {}]   ;;  %s261_s1 = inlined_call_operand.vmem [shape: f32[1,64], index: 1, kind: input, shape index: {}]   ;;  %s262_s2 = inlined_call_operand.vmem [shape: f32[1,64], index: 2, kind: input, shape index: {}]   ;;  %s263_s4 = inlined_call_operand.vmem [shape: f32[32,128], index: 4, kind: output, shape index: {0}]   ;;  %s264_s5 = inlined_call_operand.vmem [shape: f32[1,1,128], index: 5, kind: output, shape index: {1}]   ;;  %s265_s6 = inlined_call_operand.vmem [shape: f32[1,1,128], index: 6, kind: output, shape index: {2}]  }
   0x1   :  { %v51_v0 = vld [vmem:[%s259_s3 + $0x38] sm:$0xff]  ;;  %v50_v1 = vld [vmem:[%s259_s3 + $0x30] sm:$0xff]  ;;  %v49_v2 = vld [vmem:[%s259_s3 + $0x28] sm:$0xff] }
   0x2   :  { %139 = vmatpush.msra.mxu2 %v51_v0  ;;  %140 = vmatpush.msra.mxu3 %v51_v0  ;;  %v48_v3 = vld [vmem:[%s259_s3 + $0x20] sm:$0xff]  ;;  %v22_v4 = vld [vmem:[%s260_s0 + $0x10] sm:$0xff]  ;;  %v23_v7 = vld [vmem:[%s260_s0 + $0x18] sm:$0xff] }
   0x3   :  { %73 = vmatpush.msra.mxu0 %v51_v0  ;;  %138 = vmatpush.msra.mxu1 %v51_v0  ;;  %v162_v5 = vld [vmem:[%s261_s1] ss:$0 sm:$0xff]  ;;  %v21_v11 = vld [vmem:[%s260_s0 + $0x8] sm:$0xff]  ;;  %v47_v12 = vld [vmem:[%s259_s3 + $0x18] sm:$0xff] }
   0x4   :  { %142 = vmatpush.msra.mxu2 %v50_v1  ;;  %143 = vmatpush.msra.mxu3 %v50_v1  ;;  %v163_v6 = vld [vmem:[%s262_s2] ss:$0 sm:$0xff]  ;;  %v30_v9 = vmul.f32 %v162_v5, %v22_v4  ;;  %v31_v10 = vmul.f32 %v162_v5, %v23_v7  ;;  %v29_v14 = vmul.f32 %v162_v5, %v21_v11  ;;  %v46_v15 = vld [vmem:[%s259_s3 + $0x10] sm:$0xff]  ;;  %v45_v18 = vld [vmem:[%s259_s3 + $0x8] sm:$0xff] }
   0x5   :  { %74 = vmatpush.msra.mxu0 %v50_v1  ;;  %141 = vmatpush.msra.mxu1 %v50_v1  ;;  %v20_v8 = vld [vmem:[%s260_s0] sm:$0xff] }
   0x6   :  { %145 = vmatpush.msra.mxu2 %v49_v2  ;;  %146 = vmatpush.msra.mxu3 %v49_v2  ;;  %v28_v13 = vmul.f32 %v162_v5, %v20_v8  ;;  %v38_v16 = vadd.f32 %v163_v6, %v30_v9  ;;  %v39_v17 = vadd.f32 %v163_v6, %v31_v10  ;;  %v44_v21 = vld [vmem:[%s259_s3] sm:$0xff] }
   0x7   :  { %75 = vmatpush.msra.mxu0 %v49_v2  ;;  %144 = vmatpush.msra.mxu1 %v49_v2  ;;  %v37_v20 = vadd.f32 %v163_v6, %v29_v14 }
   0x8   :  { %148 = vmatpush.msra.mxu2 %v48_v3  ;;  %149 = vmatpush.msra.mxu3 %v48_v3  ;;  %v36_v19 = vadd.f32 %v163_v6, %v28_v13  ;;  %v42_v22 = vmax.f32 %v38_v16, 0.0  ;;  %v43_v23 = vmax.f32 %v39_v17, 0.0 }
   0x9   :  { %76 = vmatpush.msra.mxu0 %v48_v3  ;;  %147 = vmatpush.msra.mxu1 %v48_v3  ;;  %v41_v25 = vmax.f32 %v37_v20, 0.0 }
   0xa   :  { %151 = vmatpush.msra.mxu2 %v47_v12  ;;  %152 = vmatpush.msra.mxu3 %v47_v12  ;;  %v40_v24 = vmax.f32 %v36_v19, 0.0 }
   0xb   :  { %77 = vmatpush.msra.mxu0 %v47_v12  ;;  %150 = vmatpush.msra.mxu1 %v47_v12 }
   0xc   :  { %154 = vmatpush.msra.mxu2 %v46_v15  ;;  %155 = vmatpush.msra.mxu3 %v46_v15 }
   0xd   :  { %78 = vmatpush.msra.mxu0 %v46_v15  ;;  %153 = vmatpush.msra.mxu1 %v46_v15 }
   0xe   :  { %157 = vmatpush.msra.mxu2 %v45_v18  ;;  %158 = vmatpush.msra.mxu3 %v45_v18 }
   0xf   :  { %79 = vmatpush.msra.mxu0 %v45_v18  ;;  %156 = vmatpush.msra.mxu1 %v45_v18 }
  0x10   :  { %160 = vmatpush.msra.mxu2 %v44_v21  ;;  %161 = vmatpush.msra.mxu3 %v44_v21 }
  0x11   :  { %136 = vmatmul.msk.f32.vlgmr.msra.gmra.mxu2 %vm52_vm0, %v42_v22  ;;  %137 = vmatmul.msk.f32.vlgmr.msra.gmra.mxu3 %vm52_vm0, %v43_v23 }
  0x12   :  { %80 = vmatpush.msra.mxu0 %v44_v21  ;;  %159 = vmatpush.msra.mxu1 %v44_v21 }
  0x13   :  { %134 = vmatmul.msk.f32.vlgmr.msra.gmra.mxu0 %vm52_vm0, %v40_v24  ;;  %135 = vmatmul.msk.f32.vlgmr.msra.gmra.mxu1 %vm52_vm0, %v41_v25 }
  0x90   :  { %v82_v26 = vpop.f32.mrf.mxu0  ;;  %v85_v27 = vpop.f32.mrf.mxu1 }
  0x91   :  { %94 = vst [vmem:[%s263_s4] sm:$0xff] %v82_v26  ;;  %v108_v28 = vmul.f32 %v82_v26, %v82_v26  ;;  %v98_v29 = vadd.f32 %v85_v27, %v82_v26  ;;  %v109_v30 = vmul.f32 %v85_v27, %v85_v27 }
  0x92   :  { %95 = vst [vmem:[%s263_s4 + $0x8] sm:$0xff] %v85_v27 }
  0x93   :  { %v112_v31 = vadd.f32 %v109_v30, %v108_v28 }
  0x94   :  { %v88_v32 = vpop.f32.mrf.mxu2  ;;  %v91_v33 = vpop.f32.mrf.mxu3 }
  0x95   :  { %96 = vst [vmem:[%s263_s4 + $0x10] sm:$0xff] %v88_v32  ;;  %v99_v34 = vadd.f32 %v98_v29, %v88_v32  ;;  %v110_v35 = vmul.f32 %v88_v32, %v88_v32  ;;  %v111_v36 = vmul.f32 %v91_v33, %v91_v33 }
  0x96   :  { %97 = vst [vmem:[%s263_s4 + $0x18] sm:$0xff] %v91_v33 }
  0x97   :  { %v113_v37 = vadd.f32 %v112_v31, %v110_v35  ;;  %v100_v38 = vadd.f32 %v99_v34, %v91_v33 }
  0x99   :  { %v101_v39 = vrot.slane %v100_v38, 4  ;;  %v114_v40 = vadd.f32 %v113_v37, %v111_v36 }
  0x9b   :  { %v102_v41 = vadd.f32 %v101_v39, %v100_v38  ;;  %v115_v42 = vrot.slane %v114_v40, 4 }
  0x9d   :  { %v103_v43 = vrot.slane %v102_v41, 2  ;;  %v116_v44 = vadd.f32 %v115_v42, %v114_v40 }
  0x9f   :  { %v104_v45 = vadd.f32 %v103_v43, %v102_v41  ;;  %v117_v46 = vrot.slane %v116_v44, 2 }
  0xa1   :  { %v105_v47 = vrot.slane %v104_v45, 1  ;;  %v118_v48 = vadd.f32 %v117_v46, %v116_v44 }
  0xa3   :  { %v106_v49 = vadd.f32 %v105_v47, %v104_v45  ;;  %v119_v50 = vrot.slane %v118_v48, 1 }
  0xa5   :  { %107 = vst [vmem:[%s264_s5] sm:$0x1] %v106_v49  ;;  %v120_v51 = vadd.f32 %v119_v50, %v118_v48 }
  0xa7   :  { %121 = vst [vmem:[%s265_s6] sm:$0x1] %v120_v51 }

// kernel: halo_unet_block.4
= control target key start
LH: loop header
LB: loop body
LE: loop exit
PB: predicated region body
PF: predicated region fallthrough
CT: control target
= control target key end

     0   :  { %s956_s21 = smov 0   ;;  %s958_s22 = smov 0   ;;  %s1082_s0 = inlined_call_operand.vmem [shape: f32[2,16,64], index: 0, kind: input, shape index: {}, may-alias: {0,1,2}]   ;;  %s1083_s1 = inlined_call_operand.vmem [shape: f32[2,16,64], index: 1, kind: input, shape index: {}, may-alias: {0,1,2}]   ;;  %s1084_s2 = inlined_call_operand.vmem [shape: f32[2,16,64], index: 2, kind: input, shape index: {}, may-alias: {0,1,2}]   ;;  %s1085_s3 = inlined_call_operand.vmem [shape: f32[9,64], index: 3, kind: input, shape index: {}]   ;;  %s1086_s4 = inlined_call_operand.vmem [shape: f32[2,16,64], index: 4, kind: output, shape index: {0}]   ;;  %s1087_s5 = inlined_call_operand.vmem [shape: f32[4,1,64], index: 5, kind: output, shape index: {1}]   ;;  %s1088_s6 = inlined_call_operand.vmem [shape: f32[4,1,64], index: 6, kind: output, shape index: {2}]  }
   0x1   :  { %s960_s23 = smov 0   ;;  %s962_s24 = smov 0  }
   0x2   :  { %s964_s25 = smov 0  }
   0x3 LB: > { %s26_s26 = sadd.s32 1, %s907_s23  ;;  %s29_s27 = sadd.s32 1, %s911_s24  ;;  %s915_s25 = sphi %s964_s25, %s17_s25   ;;  %s911_s24 = sphi %s962_s24, %s1093_s24   ;;  %s907_s23 = sphi %s960_s23, %s1092_s23   ;;  %s903_s22 = sphi %s958_s22, %s1091_s22   ;;  %s899_s21 = sphi %s956_s21, %s1090_s21  }
   0x4   : > { %p27_p0 = scmp.ge.s32.totalorder %s26_s26, 2  ;;  %p808_p1 = scmp.ge.s32.totalorder %s915_s25, 1 }
   0x5   : > { %p298_p2 = scmp.lt.s32.totalorder %s915_s25, 5 }
   0x6   : > { %s1095_s26 = smov (%p27_p0, %s26_s26), 0  ;;  %s1097_s27 = smov (!%p27_p0, %s29_s27), %s911_s24 }
   0x7   : > { %p299_p3 = pnand %p808_p1, %p298_p2  ;;  %p31_p4 = scmp.ge.s32.totalorder %s1097_s27, 2 }
   0x8   : > { %p366_p5 = scmp.lt.s32.totalorder (!%p299_p3), %s903_s22, 1  ;;  %p368_p6 = scmp.lt.s32.totalorder (!%p299_p3), %s899_s21, 1 }
   0x9   : > { %s1099_s27 = smov (%p31_p4, %s1097_s27), 0  ;;  %302 = sbr.rel (%p299_p3) target bundleno = 304 (0x130), region = 36 }
   0xa   : > { %s388_s28 = sadd.s32 (!%p299_p3), 1, %s899_s21  ;;  %s811_s10 = sadd.s32 (!%p299_p3), 4294967295, %s899_s21 }
   0xb   : > { %p999_p7 = scmp.lt.s32.totalorder (!%p299_p3), %s388_s28, 1  ;;  %p375_p8 = scmp.gt.s32.totalorder (!%p299_p3), %s811_s10, 0 }
   0xc   : > { %s917_s19 = smov (!%p299_p3), 4   ;;  %p812_p9 = scmp.lt.s32.totalorder (!%p299_p3), %s811_s10, 1 }
   0xd   : > { %p444_p10 = scmp.gt.s32.totalorder (!%p299_p3), %s899_s21, 0  ;;  %s918_s16 = smov (!%p299_p3), 8  }
   0xe   : > { %v439_v0 = vlaneseq  ;;  %s367_s29 = scalar_select %p366_p5, %s903_s22, 1  ;;  %v1016_v2 = vld [vmem:[%s1085_s3] sm:$0xff]  ;;  %vm436_vm2 = vcmask 1040384   ;;  %v876_v20 = vld [vmem:[%s1085_s3 + $0x8] ss:$0 sm:$0xff]  ;;  %vm474_vm7 = vcmask 31744  }
   0xf   : > { %s369_s30 = scalar_select %p368_p6, %s899_s21, 1  ;;  %v518_v4 = vperm.slane %v1016_v2, 4  ;;  %v534_v9 = vperm.slane %v1016_v2, 5  ;;  %v496_v18 = vperm.slane %v1016_v2, 2  ;;  %v485_v19 = vperm.slane %v1016_v2, 1 }
  0x10   : > { %s997_s7 = sshll.u32 %s367_s29, 1  ;;  %v440_v1 = vshrl.u32 %v439_v0, 7  ;;  %s1101_s28 = smov (!%p999_p7, %s388_s28), 1  ;;  %v561_v21 = vperm.slane %v1016_v2, 7  ;;  %vm477_vm8 = vcmask 556032   ;;  %v507_v23 = vperm.slane %v1016_v2, 3 }
  0x11   : > { %s371_s9 = sadd.s32 %s997_s7, %s369_s30  ;;  %s1103_s28 = smov (!%p999_p7, %s1101_s28), 1  ;;  %520 = vrot.lane.b32.xlu2 %v518_v4, %s917_s19  ;;  %v550_v25 = vperm.slane %v1016_v2, 6  ;;  %vm512_vm9 = vcmask 1046528   ;;  %vm555_vm10 = vcmask 1045504   ;;  %vm593_vm11 = vcmask 523264  }
  0x12   : > { %s1005_s11 = sshll.u32 %s371_s9, 3  ;;  %v441_v3 = vadd.s32 8, %v440_v1  ;;  %s396_s20 = sadd.s32 %s997_s7, %s1103_s28  ;;  %vm442_vm4 = vcmp.ne.s32.totalorder %v440_v1, 0  ;;  %vm602_vm12 = vcmask 516096  }
  0x13   : > { %s373_s14 = scalar_lea.vmem %s1082_s0, %s1005_s11  ;;  %s823_s29 = sshll.u32 %s396_s20, 3 }
  0x14   : > { %s453_s17 = scalar_select %p368_p6, 1, 0  ;;  %v424_v5 = vld [vmem:[%s373_s14] sm:$0xff]  ;;  %vm451_vm0 = vcmp.ne.s32.totalorder %v441_v3, 9 }
  0x15   : > { %s376_s18 = scalar_select %p375_p8, %s811_s10, 0  ;;  %v431_v7 = vrot.slane %v424_v5, 7  ;;  %v482_v5 = vperm.slane %v1016_v2, 0 }
  0x16   : > { %v454_v6 = vstv %s453_s17  ;;  %s398_s12 = scalar_lea.vmem %s1084_s2, %s823_s29  ;;  %s826_s20 = sshll.u32 %s903_s22, 1 }
  0x17   : > { %vm455_vm1 = vcmp.eq.s32.totalorder %v454_v6, 1  ;;  %v426_v8 = vld [vmem:[%s398_s12] sm:$0xff]  ;;  %s1105_s18 = smov (!%p812_p9, %s376_s18), 1  ;;  %s409_s9 = scalar_lea.vmem %s1086_s4, %s1005_s11 }
  0x18   : > { %v434_v10 = vrot.slane %v426_v8, 7  ;;  %vm457_vm3 = vmor %vm451_vm0, %vm455_vm1  ;;  %s445_s8 = scalar_select %p444_p10, 1, 0 }
  0x19   : > { %s382_s13 = sadd.s32 %s1105_s18, %s997_s7  ;;  %536 = vrot.lane.b32.xlu2 %v534_v9, %s918_s16  ;;  %s919_s18 = smov 120  }
  0x1a   : > { %v438_v11 = vsel %vm436_vm2, %v431_v7, %v434_v10  ;;  %s818_s28 = sshll.u32 %s382_s13, 3  ;;  %v446_v12 = vstv %s445_s8  ;;  %s411_s12 = sadd.s32 %s899_s21, %s826_s20 }
  0x1b   : > { %v465_v13 = vsel %vm457_vm3, %v438_v11, 0.0  ;;  %s384_s15 = scalar_lea.vmem %s1083_s1, %s818_s28  ;;  %vm447_vm5 = vcmp.eq.s32.totalorder %v446_v12, 1  ;;  %p412_p11 = scmp.lt.s32.totalorder %s411_s12, 3 }
  0x1c   : > { %470 = vrot.lane.b32.xlu1 %v465_v13, %s917_s19  ;;  %v425_v14 = vld [vmem:[%s384_s15] sm:$0xff]  ;;  %vm448_vm6 = vmor %vm442_vm4, %vm447_vm5 }
  0x1d   : > { %v428_v15 = vrot.slane %v425_v14, 7  ;;  %s1107_s12 = smov (!%p412_p11, %s411_s12), 3 }
  0x1e   : > { %s414_s8 = scalar_lea.vmem %s1087_s5, %s1107_s12  ;;  %s421_s28 = scalar_lea.vmem %s1088_s6, %s1107_s12 }
  0x1f   : > { %v437_v16 = vsel %vm436_vm2, %v428_v15, %v431_v7 }
  0x20   : > { %v464_v17 = vsel %vm448_vm6, %v437_v16, 0.0 }
  0x21   : > { %468 = vrot.lane.b32.xlu0 %v464_v17, %s917_s19 }
  0x24   : > { %498 = vrot.lane.b32.xlu1 %v496_v18, %s918_s16 }
  0x29   : > { %487 = vrot.lane.b32.xlu0 %v485_v19, %s917_s19 }
  0x2c   : > { %579 = vrot.lane.b32.xlu1 %v876_v20, %s918_s16 }
  0x31   : > { %563 = vrot.lane.b32.xlu0 %v561_v21, %s917_s19  ;;  %s920_s19 = smov 124  }
  0x6b   : > { %v521_v26 = vpop.permute.xlu2 %520 }
  0x73   : > { %v537_v45 = vpop.permute.xlu2 %536 }
  0x8e   : > { %v471_v22 = vpop.permute.xlu1 %470 }
  0x8f   : > { %v476_v24 = vsel %vm474_vm7, 0.0, %v471_v22 }
  0x90   : > { %v479_v27 = vsel %vm477_vm8, %v476_v24, 0.0 }
  0x91   : > { %v524_v28 = vmul.f32 %v521_v26, %v479_v27  ;;  %v509_v29 = vmul.f32 %v507_v23, %v479_v27  ;;  %v552_v31 = vmul.f32 %v550_v25, %v479_v27  ;;  %v540_v52 = vmul.f32 %v537_v45, %v479_v27 }
  0x93   : > { %v469_v30 = vpop.permute.xlu0 %468  ;;  %v528_v36 = vrot.slane %v524_v28, 1  ;;  %v514_v38 = vrot.slane %v509_v29, 1  ;;  %v557_v41 = vrot.slane %v552_v31, 2  ;;  %v544_v57 = vrot.slane %v540_v52, 1 }
  0x94   : > { %v475_v32 = vsel %vm474_vm7, 0.0, %v469_v30 }
  0x95   : > { %v478_v33 = vsel %vm477_vm8, %v475_v32, 0.0 }
  0x96   : > { %v499_v34 = vpop.permute.xlu1 %498  ;;  %v523_v35 = vmul.f32 %v521_v26, %v478_v33  ;;  %v508_v37 = vmul.f32 %v507_v23, %v478_v33  ;;  %v551_v40 = vmul.f32 %v550_v25, %v478_v33  ;;  %v539_v51 = vmul.f32 %v537_v45, %v478_v33 }
  0x97   : > { %v501_v39 = vmul.f32 %v499_v34, %v478_v33  ;;  %v483_v7 = vmul.f32 %v482_v5, %v478_v33 }
  0x98   : > { %v527_v42 = vrot.slane %v523_v35, 1  ;;  %v513_v43 = vrot.slane %v508_v37, 1  ;;  %v556_v44 = vrot.slane %v551_v40, 2  ;;  %v543_v56 = vrot.slane %v539_v51, 1 }
  0x99   : > { %503 = vrot.lane.b32.xlu0 %v501_v39, %s919_s18 }
  0x9a   : > { %v529_v46 = vsel %vm512_vm9, %v527_v42, %v528_v36  ;;  %v515_v47 = vsel %vm512_vm9, %v513_v43, %v514_v38  ;;  %v558_v49 = vsel %vm555_vm10, %v556_v44, %v557_v41  ;;  %v545_v0 = vsel %vm512_vm9, %v543_v56, %v544_v57 }
  0x9b   : > { %530 = vrot.lane.b32.xlu1 %v529_v46, %s920_s19  ;;  %v488_v48 = vpop.permute.xlu0 %487 }
  0x9c   : > { %v490_v50 = vmul.f32 %v488_v48, %v478_v33 }
  0x9e   : > { %492 = vrot.lane.b32.xlu2 %v490_v50, %s920_s19  ;;  %v580_v53 = vpop.permute.xlu1 %579 }
  0x9f   : > { %v582_v54 = vmul.f32 %v580_v53, %v478_v33  ;;  %v583_v55 = vmul.f32 %v580_v53, %v479_v27 }
  0xa1   : > { %v586_v58 = vrot.slane %v582_v54, 2  ;;  %v587_v59 = vrot.slane %v583_v55, 2 }
  0xa3   : > { %v564_v60 = vpop.permute.xlu0 %563  ;;  %v588_v61 = vsel %vm555_vm10, %v586_v58, %v587_v59 }
  0xa4   : > { %v566_v62 = vmul.f32 %v564_v60, %v478_v33  ;;  %v567_v63 = vmul.f32 %v564_v60, %v479_v27  ;;  %589 = vrot.lane.b32.xlu1 %v588_v61, %s919_s18 }
  0xa6   : > { %v570_v1 = vrot.slane %v566_v62, 2  ;;  %v571_v3 = vrot.slane %v567_v63, 2  ;;  %546 = vrot.lane.b32.xlu2 %v545_v0, %s919_s18 }
  0xa8   : > { %v572_v4 = vsel %vm555_vm10, %v570_v1, %v571_v3 }
  0xa9   : > { %573 = vrot.lane.b32.xlu0 %v572_v4, %s920_s19 }
  0xf8   : > { %v493_v6 = vpop.permute.xlu2 %492 }
  0xf9   : > { %v495_v8 = vadd.f32 %v493_v6, %v483_v7 }
 0x100   : > { %v547_v14 = vpop.permute.xlu2 %546 }
 0x10b   : > { %v504_v9 = vpop.permute.xlu0 %503 }
 0x10c   : > { %v506_v10 = vadd.f32 %v504_v9, %v495_v8 }
 0x10d   : > { %v531_v12 = vpop.permute.xlu1 %530 }
 0x10e   : > { %v517_v11 = vadd.f32 %v515_v47, %v506_v10 }
 0x110   : > { %v533_v13 = vadd.f32 %v531_v12, %v517_v11 }
 0x112   : > { %v549_v15 = vadd.f32 %v547_v14, %v533_v13 }
 0x114   : > { %v560_v16 = vadd.f32 %v558_v49, %v549_v15 }
 0x116   : > { %v590_v2 = vpop.permute.xlu1 %589 }
 0x11b   : > { %v574_v17 = vpop.permute.xlu0 %573 }
 0x11c   : > { %v576_v18 = vadd.f32 %v574_v17, %v560_v16 }
 0x11e   : > { %v592_v19 = vadd.f32 %v590_v2, %v576_v18 }
 0x120   : > { %594 = vst.msk [vmem:[%s409_s9] sm:$0xff] %vm593_vm11, %v592_v19  ;;  %v595_v20 = vsel %vm593_vm11, %v592_v19, 0.0  ;;  %v604_v21 = vmul.f32 %v592_v19, %v592_v19 }
 0x121   : > { %v596_v22 = vrot.slane %v595_v20, 4 }
 0x122   : > { %v605_v23 = vsel %vm593_vm11, %v604_v21, 0.0 }
 0x123   : > { %v597_v24 = vadd.f32 %v596_v22, %v595_v20  ;;  %v606_v25 = vrot.slane %v605_v23, 4 }
 0x125   : > { %v598_v26 = vrot.slane %v597_v24, 2  ;;  %v607_v27 = vadd.f32 %v606_v25, %v605_v23 }
 0x127   : > { %v599_v28 = vadd.f32 %v598_v26, %v597_v24  ;;  %v608_v29 = vrot.slane %v607_v27, 2 }
 0x129   : > { %v600_v30 = vrot.slane %v599_v28, 1  ;;  %v609_v31 = vadd.f32 %v608_v29, %v607_v27 }
 0x12b   : > { %v601_v32 = vadd.f32 %v600_v30, %v599_v28  ;;  %v610_v33 = vrot.slane %v609_v31, 1 }
 0x12d   : > { %603 = vst.msk [vmem:[%s414_s8] sm:$0x1] %vm602_vm12, %v601_v32  ;;  %v611_v34 = vadd.f32 %v610_v33, %v609_v31 }
 0x12f   : > { %612 = vst.msk [vmem:[%s421_s28] sm:$0x1] %vm602_vm12, %v611_v34 }
 0x130 PF: > { %s17_s25 = sadd.s32 1, %s915_s25   ;;  %s1090_s21 = smov %s907_s23 }
 0x131   : > { %p14_p12 = scmp.ge.s32.totalorder %s17_s25, 6   ;;  %s1091_s22 = smov %s911_s24 }
 0x132   : > { %s1092_s23 = smov %s1095_s26  ;;  %s1093_s24 = smov %s1099_s27 }
 0x133   :  { %16 = sbr.rel (!%p14_p12) target bundleno = 3 (0x3), region = 96 }

// kernel: halo_unet_block.6
= control target key start
LH: loop header
LB: loop body
LE: loop exit
PB: predicated region body
PF: predicated region fallthrough
CT: control target
= control target key end

     0   :  { %s1083_s27 = smov 0   ;;  %s1085_s28 = smov 0   ;;  %s1256_s0 = inlined_call_operand.vmem [shape: f32[2,16,128], index: 0, kind: input, shape index: {}, may-alias: {0,1,2}]   ;;  %s1257_s1 = inlined_call_operand.vmem [shape: f32[2,16,128], index: 1, kind: input, shape index: {}, may-alias: {0,1,2}]   ;;  %s1258_s2 = inlined_call_operand.vmem [shape: f32[2,16,128], index: 2, kind: input, shape index: {}, may-alias: {0,1,2}]   ;;  %s1259_s3 = inlined_call_operand.vmem [shape: f32[1,128], index: 3, kind: input, shape index: {}]   ;;  %s1260_s4 = inlined_call_operand.vmem [shape: f32[1,128], index: 4, kind: input, shape index: {}]   ;;  %s1261_s5 = inlined_call_operand.vmem [shape: f32[9,128], index: 5, kind: input, shape index: {}]   ;;  %s1262_s6 = inlined_call_operand.vmem [shape: f32[2,16,128], index: 6, kind: output, shape index: {0}]   ;;  %s1263_s7 = inlined_call_operand.vmem [shape: f32[4,1,128], index: 7, kind: output, shape index: {1}]   ;;  %s1264_s8 = inlined_call_operand.vmem [shape: f32[4,1,128], index: 8, kind: output, shape index: {2}]  }
   0x1   :  { %s1087_s29 = smov 0   ;;  %s1089_s30 = smov 0  }
   0x2   :  { %s1091_s9 = smov 0  }
   0x3 LB: > { %s28_s10 = sadd.s32 1, %s1024_s29  ;;  %s31_s11 = sadd.s32 1, %s1028_s30  ;;  %s1032_s9 = sphi %s1091_s9, %s19_s9   ;;  %s1028_s30 = sphi %s1089_s30, %s1268_s30   ;;  %s1024_s29 = sphi %s1087_s29, %s1267_s29   ;;  %s1020_s28 = sphi %s1085_s28, %s1266_s28   ;;  %s1016_s27 = sphi %s1083_s27, %s1265_s27  }
   0x4   : > { %p29_p0 = scmp.ge.s32.totalorder %s28_s10, 2  ;;  %p923_p1 = scmp.ge.s32.totalorder %s1032_s9, 1 }
   0x5   : > { %p348_p2 = scmp.lt.s32.totalorder %s1032_s9, 5 }
   0x6   : > { %s1270_s10 = smov (%p29_p0, %s28_s10), 0  ;;  %s1272_s11 = smov (!%p29_p0, %s31_s11), %s1028_s30 }
   0x7   : > { %p349_p3 = pnand %p923_p1, %p348_p2  ;;  %p33_p4 = scmp.ge.s32.totalorder %s1272_s11, 2 }
   0x8   : > { %p420_p5 = scmp.lt.s32.totalorder (!%p349_p3), %s1020_s28, 1  ;;  %p422_p6 = scmp.lt.s32.totalorder (!%p349_p3), %s1016_s27, 1 }
   0x9   : > { %s1274_s11 = smov (%p33_p4, %s1272_s11), 0  ;;  %352 = sbr.rel (%p349_p3) target bundleno = 321 (0x141), region = 44 }
   0xa   : > { %s442_s12 = sadd.s32 (!%p349_p3), 1, %s1016_s27  ;;  %s926_s17 = sadd.s32 (!%p349_p3), 4294967295, %s1016_s27 }
   0xb   : > { %p443_p7 = scmp.lt.s32.totalorder (!%p349_p3), %s442_s12, 1  ;;  %p429_p8 = scmp.gt.s32.totalorder (!%p349_p3), %s926_s17, 0 }
   0xc   : > { %p927_p9 = scmp.lt.s32.totalorder (!%p349_p3), %s926_s17, 1  ;;  %p512_p10 = scmp.gt.s32.totalorder (!%p349_p3), %s1016_s27, 0 }
   0xd   : > { %s1036_s20 = smov (!%p349_p3), 112  }
   0xe   : > { %s421_s13 = scalar_select %p420_p5, %s1020_s28, 1  ;;  %v507_v0 = vlaneseq  ;;  %v1137_v3 = vld [vmem:[%s1261_s5] sm:$0xff]  ;;  %vm490_vm0 = vcmask 1040384   ;;  %v993_v28 = vld [vmem:[%s1261_s5 + $0x8] ss:$0 sm:$0xff]  ;;  %vm542_vm7 = vcmask 64512  }
   0xf   : > { %s423_s14 = scalar_select %p422_p6, %s1016_s27, 1  ;;  %v597_v5 = vperm.slane %v1137_v3, 4  ;;  %v991_v7 = vld [vmem:[%s1259_s3] ss:$0 sm:$0xff]  ;;  %v623_v15 = vperm.slane %v1137_v3, 5  ;;  %v569_v26 = vperm.slane %v1137_v3, 2 }
  0x10   : > { %s1122_s15 = sshll.u32 %s421_s13, 1  ;;  %s1276_s12 = smov (!%p443_p7, %s442_s12), 1  ;;  %v508_v2 = vshrl.u32 %v507_v0, 7  ;;  %v992_v11 = vld [vmem:[%s1260_s4] ss:$0 sm:$0xff]  ;;  %v552_v27 = vperm.slane %v1137_v3, 1 }
  0x11   : > { %s425_s16 = sadd.s32 %s1122_s15, %s423_s14  ;;  %s1278_s12 = smov (!%p443_p7, %s1276_s12), 1  ;;  %v660_v29 = vperm.slane %v1137_v3, 7  ;;  %v586_v31 = vperm.slane %v1137_v3, 3  ;;  %v649_v32 = vperm.slane %v1137_v3, 6  ;;  %vm591_vm8 = vcmask 1046528  }
  0x12   : > { %s1126_s18 = sshll.u32 %s425_s16, 3  ;;  %s450_s24 = sadd.s32 %s1122_s15, %s1278_s12  ;;  %v509_v8 = vadd.s32 8, %v508_v2  ;;  %vm510_vm4 = vcmp.ne.s32.totalorder %v508_v2, 0  ;;  %vm654_vm9 = vcmask 1045504   ;;  %vm565_vm10 = vcmask 982016  }
  0x13   : > { %s427_s21 = scalar_lea.vmem %s1256_s0, %s1126_s18  ;;  %s938_s25 = sshll.u32 %s450_s24, 3  ;;  %vm582_vm11 = vcmask 916480  }
  0x14   : > { %s521_s22 = scalar_select %p422_p6, 1, 0  ;;  %v478_v1 = vld [vmem:[%s427_s21] sm:$0xff]  ;;  %vm519_vm1 = vcmp.ne.s32.totalorder %v509_v8, 9 }
  0x15   : > { %s430_s23 = scalar_select %p429_p8, %s926_s17, 0  ;;  %v485_v4 = vrot.slane %v478_v1, 7 }
  0x16   : > { %s452_s19 = scalar_lea.vmem %s1258_s2, %s938_s25  ;;  %v522_v10 = vstv %s521_s22  ;;  %s1034_s21 = smov 8  }
  0x17   : > { %v480_v6 = vld [vmem:[%s452_s19] sm:$0xff]  ;;  %s1280_s23 = smov (!%p927_p9, %s430_s23), 1  ;;  %599 = vrot.lane.b32.xlu2 %v597_v5, %s1034_s21  ;;  %vm523_vm2 = vcmp.eq.s32.totalorder %v522_v10, 1  ;;  %s1037_s12 = smov 120  }
  0x18   : > { %v488_v9 = vrot.slane %v480_v6, 7  ;;  %s513_s17 = scalar_select %p512_p10, 1, 0  ;;  %vm525_vm3 = vmor %vm519_vm1, %vm523_vm2 }
  0x19   : > { %s436_s25 = sadd.s32 %s1280_s23, %s1122_s15  ;;  %s1035_s15 = smov 16  }
  0x1a   : > { %v492_v12 = vsel %vm490_vm0, %v485_v4, %v488_v9  ;;  %s933_s13 = sshll.u32 %s436_s25, 3  ;;  %v514_v18 = vstv %s513_s17  ;;  %s941_s17 = sshll.u32 %s1020_s28, 1 }
  0x1b   : > { %v498_v13 = vmul.f32 %v991_v7, %v492_v12  ;;  %s438_s19 = scalar_lea.vmem %s1257_s1, %s933_s13  ;;  %vm515_vm5 = vcmp.eq.s32.totalorder %v514_v18, 1  ;;  %s463_s26 = scalar_lea.vmem %s1262_s6, %s1126_s18 }
  0x1c   : > { %v479_v14 = vld [vmem:[%s438_s19] sm:$0xff]  ;;  %vm516_vm6 = vmor %vm510_vm4, %vm515_vm5  ;;  %s465_s25 = sadd.s32 %s1016_s27, %s941_s17 }
  0x1d   : > { %v504_v16 = vadd.f32 %v992_v11, %v498_v13  ;;  %v482_v17 = vrot.slane %v479_v14, 7  ;;  %p466_p11 = scmp.lt.s32.totalorder %s465_s25, 3 }
  0x1f   : > { %v506_v19 = vmax.f32 %v504_v16, 0.0  ;;  %v491_v20 = vsel %vm490_vm0, %v482_v17, %v485_v4  ;;  %625 = vrot.lane.b32.xlu2 %v623_v15, %s1035_s15  ;;  %s1282_s25 = smov (!%p466_p11, %s465_s25), 3 }
  0x20   : > { %v497_v21 = vmul.f32 %v991_v7, %v491_v20  ;;  %s468_s18 = scalar_lea.vmem %s1263_s7, %s1282_s25  ;;  %s475_s16 = scalar_lea.vmem %s1264_s8, %s1282_s25 }
  0x21   : > { %v533_v22 = vsel %vm525_vm3, %v506_v19, 0.0 }
  0x22   : > { %538 = vrot.lane.b32.xlu1 %v533_v22, %s1034_s21  ;;  %v503_v23 = vadd.f32 %v992_v11, %v497_v21 }
  0x24   : > { %v505_v24 = vmax.f32 %v503_v23, 0.0 }
  0x26   : > { %v532_v25 = vsel %vm516_vm6, %v505_v24, 0.0 }
  0x27   : > { %536 = vrot.lane.b32.xlu0 %v532_v25, %s1034_s21 }
  0x2a   : > { %571 = vrot.lane.b32.xlu1 %v569_v26, %s1035_s15 }
  0x2f   : > { %554 = vrot.lane.b32.xlu0 %v552_v27, %s1034_s21 }
  0x32   : > { %688 = vrot.lane.b32.xlu1 %v993_v28, %s1035_s15 }
  0x37   : > { %662 = vrot.lane.b32.xlu0 %v660_v29, %s1034_s21 }
  0x71   : > { %v600_v40 = vpop.permute.xlu2 %599 }
  0x79   : > { %v626_v60 = vpop.permute.xlu2 %625 }
  0x94   : > { %v539_v30 = vpop.permute.xlu1 %538 }
  0x95   : > { %v1169_v33 = vsel %vm542_vm7, 0.0, %v539_v30  ;;  %v1175_v38 = vsel %vm542_vm7, %v539_v30, 0.0 }
  0x96   : > { %v588_v34 = vmul.f32 %v586_v31, %v1169_v33  ;;  %v651_v35 = vmul.f32 %v649_v32, %v1169_v33  ;;  %v605_v47 = vmul.f32 %v600_v40, %v1175_v38  ;;  %v604_v59 = vmul.f32 %v600_v40, %v1169_v33 }
  0x97   : > { %v630_v1 = vmul.f32 %v626_v60, %v1169_v33  ;;  %v631_v2 = vmul.f32 %v626_v60, %v1175_v38 }
  0x98   : > { %v593_v43 = vrot.slane %v588_v34, 1  ;;  %v656_v45 = vrot.slane %v651_v35, 2  ;;  %v614_v57 = vrot.slane %v605_v47, 1  ;;  %v611_v63 = vrot.slane %v604_v59, 1 }
  0x99   : > { %v537_v36 = vpop.permute.xlu0 %536  ;;  %v640_v14 = vrot.slane %v631_v2, 1  ;;  %v637_v15 = vrot.slane %v630_v1, 1 }
  0x9a   : > { %v1173_v37 = vsel %vm542_vm7, 0.0, %v537_v36  ;;  %v545_v39 = vsel %vm542_vm7, %v537_v36, 0.0 }
  0x9b   : > { %v587_v42 = vmul.f32 %v586_v31, %v1173_v37  ;;  %v650_v44 = vmul.f32 %v649_v32, %v1173_v37  ;;  %v603_v48 = vmul.f32 %v600_v40, %v545_v39  ;;  %v602_v58 = vmul.f32 %v600_v40, %v1173_v37 }
  0x9c   : > { %v572_v41 = vpop.permute.xlu1 %571  ;;  %v629_v0 = vmul.f32 %v626_v60, %v545_v39  ;;  %v628_v5 = vmul.f32 %v626_v60, %v1173_v37 }
  0x9d   : > { %v574_v46 = vmul.f32 %v572_v41, %v1173_v37  ;;  %v592_v49 = vrot.slane %v587_v42, 1  ;;  %v655_v50 = vrot.slane %v650_v44, 2  ;;  %v613_v56 = vrot.slane %v603_v48, 1 }
  0x9e   : > { %v610_v62 = vrot.slane %v602_v58, 1  ;;  %v575_v6 = vmul.f32 %v572_v41, %v545_v39  ;;  %v639_v13 = vrot.slane %v629_v0, 1  ;;  %v636_v18 = vrot.slane %v628_v5, 1 }
  0x9f   : > { %578 = vrot.lane.b32.xlu1 %v574_v46, %s1036_s20  ;;  %v1183_v51 = vsel %vm591_vm8, %v592_v49, %v593_v43  ;;  %v1186_v52 = vsel %vm654_vm9, %v655_v50, %v656_v45  ;;  %v615_v61 = vsel %vm591_vm8, %v613_v56, %v614_v57 }
  0xa0   : > { %v612_v10 = vsel %vm591_vm8, %v610_v62, %v611_v63  ;;  %v641_v20 = vsel %vm591_vm8, %v639_v13, %v640_v14  ;;  %v638_v21 = vsel %vm591_vm8, %v636_v18, %v637_v15 }
  0xa1   : > { %v555_v53 = vpop.permute.xlu0 %554 }
  0xa2   : > { %v557_v54 = vmul.f32 %v555_v53, %v1173_v37  ;;  %v558_v55 = vmul.f32 %v555_v53, %v545_v39 }
  0xa4   : > { %563 = vrot.lane.b32.xlu0 %v558_v55, %s1037_s12  ;;  %561 = vrot.lane.b32.xlu2 %v557_v54, %s1037_s12  ;;  %v689_v9 = vpop.permute.xlu1 %688 }
  0xa5   : > { %v692_v16 = vmul.f32 %v689_v9, %v545_v39  ;;  %v694_v17 = vmul.f32 %v689_v9, %v1175_v38  ;;  %v691_v24 = vmul.f32 %v689_v9, %v1173_v37  ;;  %v693_v25 = vmul.f32 %v689_v9, %v1169_v33 }
  0xa7   : > { %618 = vrot.lane.b32.xlu1 %v615_v61, %s1037_s12  ;;  %v702_v22 = vrot.slane %v692_v16, 2  ;;  %v703_v23 = vrot.slane %v694_v17, 2  ;;  %v699_v29 = vrot.slane %v691_v24, 2  ;;  %v700_v30 = vrot.slane %v693_v25, 2 }
  0xa9   : > { %v663_v4 = vpop.permute.xlu0 %662  ;;  %v704_v28 = vsel %vm654_vm9, %v702_v22, %v703_v23  ;;  %v701_v34 = vsel %vm654_vm9, %v699_v29, %v700_v30 }
  0xaa   : > { %v665_v7 = vmul.f32 %v663_v4, %v1173_v37  ;;  %v667_v8 = vmul.f32 %v663_v4, %v1169_v33  ;;  %v666_v26 = vmul.f32 %v663_v4, %v545_v39  ;;  %v668_v27 = vmul.f32 %v663_v4, %v1175_v38 }
  0xab   : > { %v549_v38 = vperm.slane %v1137_v3, 0 }
  0xac   : > { %616 = vrot.lane.b32.xlu0 %v612_v10, %s1037_s12  ;;  %580 = vrot.lane.b32.xlu2 %v575_v6, %s1036_s20  ;;  %v673_v11 = vrot.slane %v665_v7, 2  ;;  %v674_v12 = vrot.slane %v667_v8, 2  ;;  %v676_v31 = vrot.slane %v666_v26, 2  ;;  %v677_v32 = vrot.slane %v668_v27, 2 }
  0xad   : > { %v550_v39 = vmul.f32 %v549_v38, %v1173_v37 }
  0xae   : > { %v675_v19 = vsel %vm654_vm9, %v673_v11, %v674_v12  ;;  %v678_v35 = vsel %vm654_vm9, %v676_v31, %v677_v32 }
  0xaf   : > { %679 = vrot.lane.b32.xlu1 %v675_v19, %s1037_s12 }
  0xb4   : > { %644 = vrot.lane.b32.xlu0 %v641_v20, %s1036_s20  ;;  %642 = vrot.lane.b32.xlu2 %v638_v21, %s1036_s20 }
  0xb7   : > { %707 = vrot.lane.b32.xlu1 %v704_v28, %s1036_s20 }
  0xbc   : > { %705 = vrot.lane.b32.xlu0 %v701_v34, %s1036_s20  ;;  %681 = vrot.lane.b32.xlu2 %v678_v35, %s1037_s12 }
  0xfe   : > { %v562_v33 = vpop.permute.xlu2 %561 }
 0x106   : > { %v581_v42 = vpop.permute.xlu2 %580 }
 0x10e   : > { %v643_v49 = vpop.permute.xlu2 %642 }
 0x111   : > { %v579_v36 = vpop.permute.xlu1 %578 }
 0x112   : > { %v583_v44 = vsel %vm582_vm11, %v579_v36, %v581_v42 }
 0x116   : > { %v564_v40 = vpop.permute.xlu0 %563  ;;  %v682_v57 = vpop.permute.xlu2 %681 }
 0x117   : > { %v566_v41 = vsel %vm565_vm10, %v562_v33, %v564_v40 }
 0x118   : > { %v568_v43 = vadd.f32 %v566_v41, %v550_v39 }
 0x119   : > { %v619_v45 = vpop.permute.xlu1 %618 }
 0x11a   : > { %v585_v46 = vadd.f32 %v583_v44, %v568_v43 }
 0x11c   : > { %v596_v47 = vadd.f32 %v1183_v51, %v585_v46 }
 0x11e   : > { %v617_v48 = vpop.permute.xlu0 %616 }
 0x11f   : > { %v620_v50 = vsel %vm565_vm10, %v617_v48, %v619_v45 }
 0x120   : > { %v622_v37 = vadd.f32 %v620_v50, %v596_v47 }
 0x121   : > { %v680_v3 = vpop.permute.xlu1 %679 }
 0x122   : > { %v683_v59 = vsel %vm565_vm10, %v680_v3, %v682_v57 }
 0x126   : > { %v645_v53 = vpop.permute.xlu0 %644 }
 0x127   : > { %v646_v54 = vsel %vm582_vm11, %v643_v49, %v645_v53 }
 0x128   : > { %v648_v55 = vadd.f32 %v646_v54, %v622_v37 }
 0x129   : > { %v708_v58 = vpop.permute.xlu1 %707 }
 0x12a   : > { %v659_v56 = vadd.f32 %v1186_v52, %v648_v55 }
 0x12c   : > { %v685_v51 = vadd.f32 %v683_v59, %v659_v56 }
 0x12e   : > { %v706_v60 = vpop.permute.xlu0 %705 }
 0x12f   : > { %v709_v61 = vsel %vm582_vm11, %v706_v60, %v708_v58 }
 0x130   : > { %v711_v62 = vadd.f32 %v709_v61, %v685_v51 }
 0x132   : > { %712 = vst [vmem:[%s463_s26] sm:$0xff] %v711_v62  ;;  %v713_v63 = vrot.slane %v711_v62, 4  ;;  %v720_v0 = vmul.f32 %v711_v62, %v711_v62 }
 0x134   : > { %v714_v52 = vadd.f32 %v713_v63, %v711_v62  ;;  %v721_v1 = vrot.slane %v720_v0, 4 }
 0x136   : > { %v715_v2 = vrot.slane %v714_v52, 2  ;;  %v722_v4 = vadd.f32 %v721_v1, %v720_v0 }
 0x138   : > { %v716_v5 = vadd.f32 %v715_v2, %v714_v52  ;;  %v723_v6 = vrot.slane %v722_v4, 2 }
 0x13a   : > { %v717_v7 = vrot.slane %v716_v5, 1  ;;  %v724_v8 = vadd.f32 %v723_v6, %v722_v4 }
 0x13c   : > { %v718_v9 = vadd.f32 %v717_v7, %v716_v5  ;;  %v725_v10 = vrot.slane %v724_v8, 1 }
 0x13e   : > { %719 = vst [vmem:[%s468_s18] sm:$0x1] %v718_v9  ;;  %v726_v11 = vadd.f32 %v725_v10, %v724_v8 }
 0x140   : > { %727 = vst [vmem:[%s475_s16] sm:$0x1] %v726_v11 }
 0x141 PF: > { %s19_s9 = sadd.s32 1, %s1032_s9   ;;  %s1265_s27 = smov %s1024_s29 }
 0x142   : > { %p16_p12 = scmp.ge.s32.totalorder %s19_s9, 6   ;;  %s1266_s28 = smov %s1028_s30 }
 0x143   : > { %s1267_s29 = smov %s1270_s10  ;;  %s1268_s30 = smov %s1274_s11 }
 0x144   :  { %18 = sbr.rel (!%p16_p12) target bundleno = 3 (0x3), region = 104 }

// kernel: halo_unet_block.7
= control target key start
LH: loop header
LB: loop body
LE: loop exit
PB: predicated region body
PF: predicated region fallthrough
CT: control target
= control target key end

     0   :  { %s298_s3 = inlined_call_operand.vmem [shape: f32[128,128], index: 3, kind: input, shape index: {}]   ;;  %s299_s1 = inlined_call_operand.vmem [shape: f32[1,128], index: 1, kind: input, shape index: {}]   ;;  %s300_s2 = inlined_call_operand.vmem [shape: f32[1,128], index: 2, kind: input, shape index: {}]   ;;  %s301_s0 = inlined_call_operand.vmem [shape: f32[32,128], index: 0, kind: input, shape index: {}]   ;;  %s302_s4 = inlined_call_operand.vmem [shape: f32[32,128], index: 4, kind: output, shape index: {0}]   ;;  %s303_s5 = inlined_call_operand.vmem [shape: f32[1,1,128], index: 5, kind: output, shape index: {1}]   ;;  %s304_s6 = inlined_call_operand.vmem [shape: f32[1,1,128], index: 6, kind: output, shape index: {2}]  }
   0x1   :  { %v59_v0 = vld [vmem:[%s298_s3 + $0x78] sm:$0xff]  ;;  %v58_v1 = vld [vmem:[%s298_s3 + $0x70] sm:$0xff]  ;;  %v57_v2 = vld [vmem:[%s298_s3 + $0x68] sm:$0xff] }
   0x2   :  { %130 = vmatpush.msra.mxu2 %v59_v0  ;;  %131 = vmatpush.msra.mxu3 %v59_v0  ;;  %v56_v3 = vld [vmem:[%s298_s3 + $0x60] sm:$0xff]  ;;  %v55_v4 = vld [vmem:[%s298_s3 + $0x58] sm:$0xff]  ;;  %v54_v5 = vld [vmem:[%s298_s3 + $0x50] sm:$0xff] }
   0x3   :  { %60 = vmatpush.msra.mxu0 %v59_v0  ;;  %129 = vmatpush.msra.mxu1 %v59_v0  ;;  %v53_v6 = vld [vmem:[%s298_s3 + $0x48] sm:$0xff]  ;;  %v52_v7 = vld [vmem:[%s298_s3 + $0x40] sm:$0xff]  ;;  %v51_v8 = vld [vmem:[%s298_s3 + $0x38] sm:$0xff] }
   0x4   :  { %133 = vmatpush.msra.mxu2 %v58_v1  ;;  %134 = vmatpush.msra.mxu3 %v58_v1  ;;  %v50_v9 = vld [vmem:[%s298_s3 + $0x30] sm:$0xff]  ;;  %v177_v10 = vld [vmem:[%s299_s1] ss:$0 sm:$0xff]  ;;  %v23_v12 = vld [vmem:[%s301_s0 + $0x18] sm:$0xff] }
   0x5   :  { %61 = vmatpush.msra.mxu0 %v58_v1  ;;  %132 = vmatpush.msra.mxu1 %v58_v1  ;;  %v22_v11 = vld [vmem:[%s301_s0 + $0x10] sm:$0xff]  ;;  %v49_v13 = vld [vmem:[%s298_s3 + $0x28] sm:$0xff]  ;;  %v20_v14 = vld [vmem:[%s301_s0] sm:$0xff]  ;;  %v31_v19 = vmul.f32 %v177_v10, %v23_v12 }
   0x6   :  { %136 = vmatpush.msra.mxu2 %v57_v2  ;;  %137 = vmatpush.msra.mxu3 %v57_v2  ;;  %v21_v15 = vld [vmem:[%s301_s0 + $0x8] sm:$0xff]  ;;  %v48_v16 = vld [vmem:[%s298_s3 + $0x20] sm:$0xff]  ;;  %v30_v17 = vmul.f32 %v177_v10, %v22_v11  ;;  %v47_v20 = vld [vmem:[%s298_s3 + $0x18] sm:$0xff]  ;;  %v28_v21 = vmul.f32 %v177_v10, %v20_v14 }
   0x7   :  { %62 = vmatpush.msra.mxu0 %v57_v2  ;;  %135 = vmatpush.msra.mxu1 %v57_v2  ;;  %v178_v18 = vld [vmem:[%s300_s2] ss:$0 sm:$0xff]  ;;  %v29_v22 = vmul.f32 %v177_v10, %v21_v15  ;;  %v46_v23 = vld [vmem:[%s298_s3 + $0x10] sm:$0xff]  ;;  %v45_v26 = vld [vmem:[%s298_s3 + $0x8] sm:$0xff] }
   0x8   :  { %139 = vmatpush.msra.mxu2 %v56_v3  ;;  %140 = vmatpush.msra.mxu3 %v56_v3  ;;  %v38_v24 = vadd.f32 %v178_v18, %v30_v17  ;;  %v39_v25 = vadd.f32 %v178_v18, %v31_v19  ;;  %v36_v27 = vadd.f32 %v178_v18, %v28_v21  ;;  %v44_v29 = vld [vmem:[%s298_s3] sm:$0xff] }
   0x9   :  { %63 = vmatpush.msra.mxu0 %v56_v3  ;;  %138 = vmatpush.msra.mxu1 %v56_v3  ;;  %v37_v28 = vadd.f32 %v178_v18, %v29_v22 }
   0xa   :  { %142 = vmatpush.msra.mxu2 %v55_v4  ;;  %143 = vmatpush.msra.mxu3 %v55_v4  ;;  %v42_v30 = vmax.f32 %v38_v24, 0.0  ;;  %v43_v31 = vmax.f32 %v39_v25, 0.0  ;;  %v40_v32 = vmax.f32 %v36_v27, 0.0 }
   0xb   :  { %64 = vmatpush.msra.mxu0 %v55_v4  ;;  %141 = vmatpush.msra.mxu1 %v55_v4  ;;  %v41_v33 = vmax.f32 %v37_v28, 0.0 }
   0xc   :  { %145 = vmatpush.msra.mxu2 %v54_v5  ;;  %146 = vmatpush.msra.mxu3 %v54_v5 }
   0xd   :  { %65 = vmatpush.msra.mxu0 %v54_v5  ;;  %144 = vmatpush.msra.mxu1 %v54_v5 }
   0xe   :  { %148 = vmatpush.msra.mxu2 %v53_v6  ;;  %149 = vmatpush.msra.mxu3 %v53_v6 }
   0xf   :  { %66 = vmatpush.msra.mxu0 %v53_v6  ;;  %147 = vmatpush.msra.mxu1 %v53_v6 }
  0x10   :  { %151 = vmatpush.msra.mxu2 %v52_v7  ;;  %152 = vmatpush.msra.mxu3 %v52_v7 }
  0x11   :  { %67 = vmatpush.msra.mxu0 %v52_v7  ;;  %150 = vmatpush.msra.mxu1 %v52_v7 }
  0x12   :  { %154 = vmatpush.msra.mxu2 %v51_v8  ;;  %155 = vmatpush.msra.mxu3 %v51_v8 }
  0x13   :  { %68 = vmatpush.msra.mxu0 %v51_v8  ;;  %153 = vmatpush.msra.mxu1 %v51_v8 }
  0x14   :  { %157 = vmatpush.msra.mxu2 %v50_v9  ;;  %158 = vmatpush.msra.mxu3 %v50_v9 }
  0x15   :  { %69 = vmatpush.msra.mxu0 %v50_v9  ;;  %156 = vmatpush.msra.mxu1 %v50_v9 }
  0x16   :  { %160 = vmatpush.msra.mxu2 %v49_v13  ;;  %161 = vmatpush.msra.mxu3 %v49_v13 }
  0x17   :  { %70 = vmatpush.msra.mxu0 %v49_v13  ;;  %159 = vmatpush.msra.mxu1 %v49_v13 }
  0x18   :  { %163 = vmatpush.msra.mxu2 %v48_v16  ;;  %164 = vmatpush.msra.mxu3 %v48_v16 }
  0x19   :  { %71 = vmatpush.msra.mxu0 %v48_v16  ;;  %162 = vmatpush.msra.mxu1 %v48_v16 }
  0x1a   :  { %166 = vmatpush.msra.mxu2 %v47_v20  ;;  %167 = vmatpush.msra.mxu3 %v47_v20 }
  0x1b   :  { %72 = vmatpush.msra.mxu0 %v47_v20  ;;  %165 = vmatpush.msra.mxu1 %v47_v20 }
  0x1c   :  { %169 = vmatpush.msra.mxu2 %v46_v23  ;;  %170 = vmatpush.msra.mxu3 %v46_v23 }
  0x1d   :  { %73 = vmatpush.msra.mxu0 %v46_v23  ;;  %168 = vmatpush.msra.mxu1 %v46_v23 }
  0x1e   :  { %172 = vmatpush.msra.mxu2 %v45_v26  ;;  %173 = vmatpush.msra.mxu3 %v45_v26 }
  0x1f   :  { %74 = vmatpush.msra.mxu0 %v45_v26  ;;  %171 = vmatpush.msra.mxu1 %v45_v26 }
  0x20   :  { %175 = vmatpush.msra.mxu2 %v44_v29  ;;  %176 = vmatpush.msra.mxu3 %v44_v29 }
  0x21   :  { %82 = vmatmul.f32.vlgmr.msra.gmra.mxu2 %v42_v30  ;;  %85 = vmatmul.f32.vlgmr.msra.gmra.mxu3 %v43_v31 }
  0x22   :  { %75 = vmatpush.msra.mxu0 %v44_v29  ;;  %174 = vmatpush.msra.mxu1 %v44_v29 }
  0x23   :  { %76 = vmatmul.f32.vlgmr.msra.gmra.mxu0 %v40_v32  ;;  %79 = vmatmul.f32.vlgmr.msra.gmra.mxu1 %v41_v33 }
  0xa0   :  { %v77_v34 = vpop.f32.mrf.mxu0  ;;  %v80_v35 = vpop.f32.mrf.mxu1 }
  0xa1   :  { %89 = vst [vmem:[%s302_s4] sm:$0xff] %v77_v34  ;;  %v103_v36 = vmul.f32 %v77_v34, %v77_v34  ;;  %v93_v37 = vadd.f32 %v80_v35, %v77_v34  ;;  %v104_v38 = vmul.f32 %v80_v35, %v80_v35 }
  0xa2   :  { %90 = vst [vmem:[%s302_s4 + $0x8] sm:$0xff] %v80_v35 }
  0xa3   :  { %v107_v39 = vadd.f32 %v104_v38, %v103_v36 }
  0xa4   :  { %v83_v40 = vpop.f32.mrf.mxu2  ;;  %v86_v41 = vpop.f32.mrf.mxu3 }
  0xa5   :  { %91 = vst [vmem:[%s302_s4 + $0x10] sm:$0xff] %v83_v40  ;;  %v94_v42 = vadd.f32 %v93_v37, %v83_v40  ;;  %v105_v43 = vmul.f32 %v83_v40, %v83_v40  ;;  %v106_v44 = vmul.f32 %v86_v41, %v86_v41 }
  0xa6   :  { %92 = vst [vmem:[%s302_s4 + $0x18] sm:$0xff] %v86_v41 }
  0xa7   :  { %v108_v45 = vadd.f32 %v107_v39, %v105_v43  ;;  %v95_v46 = vadd.f32 %v94_v42, %v86_v41 }
  0xa9   :  { %v96_v47 = vrot.slane %v95_v46, 4  ;;  %v109_v48 = vadd.f32 %v108_v45, %v106_v44 }
  0xab   :  { %v97_v49 = vadd.f32 %v96_v47, %v95_v46  ;;  %v110_v50 = vrot.slane %v109_v48, 4 }
  0xad   :  { %v98_v51 = vrot.slane %v97_v49, 2  ;;  %v111_v52 = vadd.f32 %v110_v50, %v109_v48 }
  0xaf   :  { %v99_v53 = vadd.f32 %v98_v51, %v97_v49  ;;  %v112_v54 = vrot.slane %v111_v52, 2 }
  0xb1   :  { %v100_v55 = vrot.slane %v99_v53, 1  ;;  %v113_v56 = vadd.f32 %v112_v54, %v111_v52 }
  0xb3   :  { %v101_v57 = vadd.f32 %v100_v55, %v99_v53  ;;  %v114_v58 = vrot.slane %v113_v56, 1 }
  0xb5   :  { %102 = vst [vmem:[%s303_s5] sm:$0x1] %v101_v57  ;;  %v115_v59 = vadd.f32 %v114_v58, %v113_v56 }
  0xb7   :  { %116 = vst [vmem:[%s304_s6] sm:$0x1] %v115_v59 }

</bundles_post_ra>
